<compile_context>
chip_gen: v6e
topology: v6e:2x2x1
jax: 0.10.0
libtpu: 0.0.40
codegen_flags: <defaults>
</compile_context>

<pallas_src>
import functools
import inspect

import jax
import jax.numpy as jnp
import numpy as np
from jax.experimental import pallas as pl
from jax.experimental.pallas import tpu as pltpu


def _round_up(x, m):
    return (x + m - 1) // m * m


def _vmem_capacity_bytes():
    """Physical VMEM per TensorCore; falls back to the smallest modern chip (v7x: 64 MiB)."""
    try:
        cap = getattr(pltpu.get_tpu_info(), "vmem_capacity_bytes", None)
        if cap:
            return int(cap)
    except Exception:        # hardware query only — never masks kernel/lowering errors
        pass
    return 64 << 20


def _buffered_supported():
    """True iff this JAX build accepts BlockSpec(pipeline_mode=pl.Buffered(k))."""
    if not hasattr(pl, "Buffered"):
        return False
    try:
        return "pipeline_mode" in inspect.signature(pl.BlockSpec).parameters
    except (TypeError, ValueError):
        return False


def calip_fs_kernel(
    fs_ref, fv_ref, u_ref,               # per-batch blocks: (1,Bt*S,D), (1,Bt,D), (1,Bt,D)
    ftT_ref, qtT_ref, ktT_ref, vt_ref,   # batch-invariant text branch: (D,Tp)x3, (Tp,D)
    w1_ref, b1_ref, w2_ref, b2_ref,      # pre-projection MLP
    w3_ref, b3_ref,                      # fused q/k/v projection: (P2,3D), (1,3D)
    wp_ref, bp_ref,                      # post projection (only the spatial->text branch needs it)
    out_ref,                             # (1, Bt, Tp)
    *, scale, c1, c2, c3, S, T, compute_dtype,
):
    _, M, D = fs_ref.shape               # M = Bt * S
    Bt = M // S
    Tp = ftT_ref.shape[1]
    cdt = compute_dtype
    f32 = jnp.float32

    def mxu(a, b):                       # plain (M,K)@(K,N) MXU dot, f32 accumulation
        return jnp.dot(a.astype(cdt), b, preferred_element_type=f32)

    # ---- spatial branch: L2 normalize + pre-projection MLP on the flat (Bt*S, D) slab ----
    fs = fs_ref[0].astype(f32)
    fs = fs * jax.lax.rsqrt(jnp.sum(fs * fs, axis=-1, keepdims=True))   # no eps (matches torch)

    h = jnp.maximum(mxu(fs, w1_ref[...]) + b1_ref[...], 0.0)
    h = jnp.maximum(mxu(h, w2_ref[...]) + b2_ref[...], 0.0)
    qkv = mxu(h, w3_ref[...]) + b3_ref[...]
    q_s = qkv[:, :D]
    k_s = qkv[:, D:2 * D]
    v_s = qkv[:, 2 * D:]

    # ---- spatial -> text attention (k_t / v_t shared => fully flat over Bt*S) ----
    s_st = mxu(q_s, ktT_ref[...]) * scale                        # (Bt*S, Tp)
    if T < Tp:                                                   # mask zero-padded class columns
        col = jax.lax.broadcasted_iota(jnp.int32, (1, Tp), 1)
        s_st = s_st + jnp.where(col < T, 0.0, -1e30)
    s_st = s_st - jnp.max(s_st, axis=-1, keepdims=True)
    e_st = jnp.exp(s_st)
    As = e_st * pl.reciprocal(jnp.sum(e_st, axis=-1, keepdims=True), approx=True)
    fsa = mxu(As, vt_ref[...])                                   # (Bt*S, D)
    fsa = mxu(fsa, wp_ref[...]) + bp_ref[...]                    # post-projection
    fsa3 = fsa.reshape(Bt, S, D)
    fva = jnp.mean(fsa3, axis=1) + jnp.max(fsa3, axis=1)         # avg-pool + max-pool over S

    # ---- text -> spatial attention, folded into r2 (no Fta materialization) ----
    s_ts = mxu(k_s, qtT_ref[...]) * scale                        # (Bt*S, Tp): scores[b,s,t]
    s_ts3 = s_ts.reshape(Bt, S, Tp)
    s_ts3 = s_ts3 - jnp.max(s_ts3, axis=1, keepdims=True)        # softmax over S (sublane reduce)
    e_ts = jnp.exp(s_ts3)
    at = e_ts * pl.reciprocal(jnp.sum(e_ts, axis=1, keepdims=True), approx=True)
    u = u_ref[0]                                                 # (Bt, D) = Wp @ fv (precomputed)
    vdotu = jnp.sum(v_s.reshape(Bt, S, D) * u[:, None, :], axis=-1)     # (Bt, S) lane reduce
    r2 = jnp.sum(at * vdotu[:, :, None], axis=1)                 # (Bt, Tp); + fv.bp added in wrapper

    # ---- logits (beta_i * logit_scale folded into c1 / c2 / c3) ----
    fv = fv_ref[0]                                               # (Bt, D)
    r1 = mxu(fv, ftT_ref[...])                                   # (Bt, Tp)
    r3 = mxu(fva, ftT_ref[...])                                  # (Bt, Tp)
    out_ref[0] = (c1 * r1 + c2 * r2 + c3 * r3).astype(out_ref.dtype)


def calip_fs_block(Fs, Ft, Fv, params, *, beta_1, beta_2, beta_3,
                   compute_dtype=jnp.bfloat16, min_grid=2):
    """Fs: (B,S,D)  Ft: (T,D)  Fv: (B,D)  ->  (B,1,T) logits."""
    B, S, D = Fs.shape
    T, _ = Ft.shape
    P1 = params["w1"].shape[1]
    P2 = params["w2"].shape[1]
    Tp = _round_up(T, 128)               # lane-dense class dim (scores, PV K-dim, output stores)
    cdt = jnp.dtype(compute_dtype)
    f32 = jnp.float32

    scale = float(D) ** (-0.5)
    logit_scale = float(np.exp(np.log(1.0 / 0.07)))
    c1 = float(beta_1) * logit_scale
    c2 = float(beta_2) * logit_scale
    c3 = float(beta_3) * logit_scale

    # --- batch-invariant text branch: computed once, outside the grid (plain XLA, f32) ---
    h_t = jax.nn.relu(Ft @ params["w1"] + params["b1"])
    h_t = jax.nn.relu(h_t @ params["w2"] + params["b2"])
    q_t = h_t @ params["w3q"] + params["b3q"]
    k_t = h_t @ params["w3k"] + params["b3k"]
    v_t = h_t @ params["w3v"] + params["b3v"]

    def pad_cols(xT):                    # (D, T) -> (D, Tp): zero-pad class columns
        return jnp.pad(xT, ((0, 0), (0, Tp - T))) if Tp > T else xT

    ftT = pad_cols(Ft.T).astype(cdt)     # pre-transposed so in-kernel dots are plain A@B
    qtT = pad_cols(q_t.T).astype(cdt)
    ktT = pad_cols(k_t.T).astype(cdt)
    vt = (jnp.pad(v_t, ((0, Tp - T), (0, 0))) if Tp > T else v_t).astype(cdt)

    # --- fused q/k/v projection + weight dtypes for the in-kernel spatial branch ---
    w3 = jnp.concatenate([params["w3q"], params["w3k"], params["w3v"]], axis=1).astype(cdt)
    b3 = jnp.concatenate([params["b3q"], params["b3k"], params["b3v"]], axis=1).astype(f32)
    w1 = params["w1"].astype(cdt); b1 = params["b1"].astype(f32)
    w2 = params["w2"].astype(cdt); b2 = params["b2"].astype(f32)
    wp = params["wp"].astype(cdt); bp = params["bp"].astype(f32)

    # --- r2 algebraic-fold helpers (grid-invariant per batch element, tiny XLA matmuls) ---
    U = (Fv @ params["wp"].T).astype(f32)        # u[b] = Wp @ fv[b]
    bias2 = (Fv @ params["bp"][0]).astype(f32)   # fv[b] . bp  (added back after the kernel)
    Fv32 = Fv.astype(f32)
    Fs_c = Fs.astype(cdt)

    # --- per-generation VMEM budget and batch-tile (Bt) selection ---
    use_buffered = _buffered_supported()
    csize = cdt.itemsize
    cap = _vmem_capacity_bytes()                 # 128 MiB on v5e/v6e, 64 MiB per TC on v7x
    budget = int(cap * 0.60)
    vmem_limit = int(cap * 0.75)

    const_bytes = (csize * (4 * D * Tp + D * P1 + P1 * P2 + P2 * 3 * D + D * D)
                   + 4 * (P1 + P2 + 3 * D + D))
    const_mult = 1 if use_buffered else 2        # Buffered(1) single-buffers the constants

    def step_bytes(bt):
        io = 2 * (bt * S * D * csize + 2 * bt * D * 4 + bt * Tp * 4)   # double-buffered I/O
        interm = 4 * bt * S * (7 * D + P1 + P2 + 3 * Tp)               # rough f32 live set
        return io + interm

    limit = max(1, B // min_grid) if B >= min_grid else B   # keep G >= min_grid (v7x: 2 TCs)
    Bt = 1
    for d in sorted((d for d in range(1, limit + 1) if B % d == 0), reverse=True):
        if const_mult * const_bytes + step_bytes(d) <= budget:
            Bt = d
            break
    G = B // Bt

    Fs_b = Fs_c.reshape(G, Bt * S, D)            # wrapper-side reshapes: free layout plumbing
    Fv_b = Fv32.reshape(G, Bt, D)
    U_b = U.reshape(G, Bt, D)

    kernel = functools.partial(calip_fs_kernel, scale=scale, c1=c1, c2=c2, c3=c3,
                               S=S, T=T, compute_dtype=cdt)

    cost = pl.CostEstimate(
        flops=int(2 * B * S * (D * P1 + P1 * P2 + 3 * P2 * D + 3 * Tp * D + D * D)
                  + 4 * B * D * Tp + 4 * B * S * (D + Tp)),
        transcendentals=int(2 * B * S * Tp + B * S),
        bytes_accessed=int(B * S * D * csize + 8 * B * D + 4 * B * Tp + const_bytes),
    )

    def const_spec(shape, buffered):
        index_map = lambda g: tuple(0 for _ in shape)
        if buffered:
            return pl.BlockSpec(shape, index_map, pipeline_mode=pl.Buffered(1))
        return pl.BlockSpec(shape, index_map)

    def run(buffered):
        grid_spec = pltpu.PrefetchScalarGridSpec(
            num_scalar_prefetch=0,
            grid=(G,),
            in_specs=[
                pl.BlockSpec((1, Bt * S, D), lambda g: (g, 0, 0)),      # Fs slab
                pl.BlockSpec((1, Bt, D), lambda g: (g, 0, 0)),          # Fv
                pl.BlockSpec((1, Bt, D), lambda g: (g, 0, 0)),          # U = Wp @ fv
                const_spec((D, Tp), buffered), const_spec((D, Tp), buffered),
                const_spec((D, Tp), buffered), const_spec((Tp, D), buffered),
                const_spec((D, P1), buffered), const_spec((1, P1), buffered),
                const_spec((P1, P2), buffered), const_spec((1, P2), buffered),
                const_spec((P2, 3 * D), buffered), const_spec((1, 3 * D), buffered),
                const_spec((D, D), buffered), const_spec((1, D), buffered),
            ],
            out_specs=pl.BlockSpec((1, Bt, Tp), lambda g: (g, 0, 0)),
        )
        return pl.pallas_call(
            kernel,
            out_shape=jax.ShapeDtypeStruct((G, Bt, Tp), jnp.float32),
            grid_spec=grid_spec,
            compiler_params=pltpu.CompilerParams(
                dimension_semantics=("parallel",),     # v7x: batch grid split across the 2 TCs
                vmem_limit_bytes=vmem_limit),
            cost_estimate=cost,
        )(Fs_b, Fv_b, U_b, ftT, qtT, ktT, vt,
          w1, b1, w2, b2, w3, b3, wp, bp)

    if use_buffered:
        try:
            out = run(True)
        except Exception:
            # Narrow fallback: only reachable when this build's TPU lowering rejects
            # Buffered(1); genuine kernel errors surface again from the unbuffered run.
            out = run(False)
    else:
        out = run(False)

    out = out.reshape(B, Tp)[:, :T] + c2 * bias2[:, None]   # add the folded fv.bp term of r2
    return out.reshape(B, 1, T)


def calip_fs_block_ref(Fs, Ft, Fv, params, *, beta_1, beta_2, beta_3):
    """Pure-JAX f32 reference mirroring the PyTorch forward."""
    B, S, D = Fs.shape
    scale = float(D) ** (-0.5)
    logit_scale = float(np.exp(np.log(1.0 / 0.07)))
    Ft_b = jnp.broadcast_to(Ft[None], (B,) + Ft.shape)
    Fs = Fs / jnp.linalg.norm(Fs, axis=-1, keepdims=True)
    Fv = Fv[:, None, :]

    def pre(x):
        h = jax.nn.relu(x @ params["w1"] + params["b1"])
        h = jax.nn.relu(h @ params["w2"] + params["b2"])
        return (h @ params["w3q"] + params["b3q"],
                h @ params["w3k"] + params["b3k"],
                h @ params["w3v"] + params["b3v"])

    q_t, k_t, v_t = pre(Ft_b)
    q_s, k_s, v_s = pre(Fs)
    At = jax.nn.softmax(scale * jnp.einsum("btd,bsd->bts", q_t, k_s), axis=-1)
    As = jax.nn.softmax(scale * jnp.einsum("bsd,btd->bst", q_s, k_t), axis=-1)
    Fta = jnp.einsum("bts,bsd->btd", At, v_s) @ params["wp"] + params["bp"]
    Fsa = jnp.einsum("bst,btd->bsd", As, v_t) @ params["wp"] + params["bp"]
    Fva = jnp.mean(Fsa, axis=1, keepdims=True) + jnp.max(Fsa, axis=1, keepdims=True)
    res = beta_1 * logit_scale * jnp.einsum("bvd,btd->bvt", Fv, Ft_b)
    res = res + beta_2 * logit_scale * jnp.einsum("bvd,btd->bvt", Fv, Fta)
    res = res + beta_3 * logit_scale * jnp.einsum("bvd,btd->bvt", Fva, Ft_b)
    return res


if __name__ == "__main__":
    # small, module-consistent shapes (min_grid=2 -> Bt=2 per grid step, 2 grid steps)
    B, S, T, D = 4, 16, 8, 32          # batch, spatial tokens, classes, input_dim
    P1, P2 = 64, 32                    # pre_dim1, pre_dim2
    beta_1, beta_2, beta_3 = 1.0, 0.5, 0.25

    keys = jax.random.split(jax.random.PRNGKey(0), 15)

    # deterministic synthetic parameters (Linear stored as (in, out); biases as (1, out))
    def w(k, shape, fan_in):
        return (jax.random.normal(k, shape, jnp.float32) / np.sqrt(fan_in)).astype(jnp.float32)

    params = {
        "w1":  w(keys[0], (D, P1), D),   "b1":  w(keys[1], (1, P1), D),
        "w2":  w(keys[2], (P1, P2), P1), "b2":  w(keys[3], (1, P2), P1),
        "w3q": w(keys[4], (P2, D), P2),  "b3q": w(keys[5], (1, D), P2),
        "w3k": w(keys[6], (P2, D), P2),  "b3k": w(keys[7], (1, D), P2),
        "w3v": w(keys[8], (P2, D), P2),  "b3v": w(keys[9], (1, D), P2),
        "wp":  w(keys[10], (D, D), D),   "bp":  w(keys[11], (1, D), D),
    }
    Fs = jax.random.normal(keys[12], (B, S, D), jnp.float32)
    Ft = jax.random.normal(keys[13], (T, D), jnp.float32)
    Fv = jax.random.normal(keys[14], (B, D), jnp.float32)

    ref = jax.block_until_ready(
        calip_fs_block_ref(Fs, Ft, Fv, params, beta_1=beta_1, beta_2=beta_2, beta_3=beta_3))

    # f32 parity path: structural / math check against the pure-JAX reference.
    out32 = jax.block_until_ready(
        calip_fs_block(Fs, Ft, Fv, params, beta_1=beta_1, beta_2=beta_2, beta_3=beta_3,
                       compute_dtype=jnp.float32))
    assert out32.shape == (B, 1, T), out32.shape
    np.testing.assert_allclose(np.asarray(out32), np.asarray(ref), rtol=2e-2, atol=3e-2)

    # bf16 production path (bf16 MXU operands, f32 accumulation): scale-relative check.
    out16 = jax.block_until_ready(
        calip_fs_block(Fs, Ft, Fv, params, beta_1=beta_1, beta_2=beta_2, beta_3=beta_3,
                       compute_dtype=jnp.bfloat16))
    assert out16.shape == (B, 1, T), out16.shape
    rel = float(np.max(np.abs(np.asarray(out16) - np.asarray(ref)))
                / (np.max(np.abs(np.asarray(ref))) + 1e-6))
    assert rel < 4e-2, f"bf16 path relative error too large: {rel}"

    print("KERNEL_OK")
</pallas_src>

<mosaic_0001>
module attributes {stable_mosaic.version = 11 : i64} {
  func.func @calip_fs_kernel(%arg0: i32, %arg1: memref<1x32x32xf32, #tpu.memory_space<vmem>>, %arg2: memref<1x2x32xf32, #tpu.memory_space<vmem>>, %arg3: memref<1x2x32xf32, #tpu.memory_space<vmem>>, %arg4: memref<32x128xf32, #tpu.memory_space<vmem>>, %arg5: memref<32x128xf32, #tpu.memory_space<vmem>>, %arg6: memref<32x128xf32, #tpu.memory_space<vmem>>, %arg7: memref<128x32xf32, #tpu.memory_space<vmem>>, %arg8: memref<32x64xf32, #tpu.memory_space<vmem>>, %arg9: memref<1x64xf32, #tpu.memory_space<vmem>>, %arg10: memref<64x32xf32, #tpu.memory_space<vmem>>, %arg11: memref<1x32xf32, #tpu.memory_space<vmem>>, %arg12: memref<32x96xf32, #tpu.memory_space<vmem>>, %arg13: memref<1x96xf32, #tpu.memory_space<vmem>>, %arg14: memref<32x32xf32, #tpu.memory_space<vmem>>, %arg15: memref<1x32xf32, #tpu.memory_space<vmem>>, %arg16: memref<1x2x128xf32, #tpu.memory_space<vmem>>) attributes {dimension_semantics = [#tpu.dimension_semantics<parallel>], iteration_bounds = array<i64: 2>, scalar_prefetch = 0 : i64, scratch_operands = 0 : i64, tpu.core_type = #tpu.core_type<tc>, window_params = [{transform_indices = @transform_0, window_bounds = array<i64: 1, 32, 32>}, {transform_indices = @transform_1, window_bounds = array<i64: 1, 2, 32>}, {transform_indices = @transform_2, window_bounds = array<i64: 1, 2, 32>}, {pipeline_mode = #tpu.pipeline_mode<synchronous>, transform_indices = @transform_3, window_bounds = array<i64: 32, 128>}, {pipeline_mode = #tpu.pipeline_mode<synchronous>, transform_indices = @transform_4, window_bounds = array<i64: 32, 128>}, {pipeline_mode = #tpu.pipeline_mode<synchronous>, transform_indices = @transform_5, window_bounds = array<i64: 32, 128>}, {pipeline_mode = #tpu.pipeline_mode<synchronous>, transform_indices = @transform_6, window_bounds = array<i64: 128, 32>}, {pipeline_mode = #tpu.pipeline_mode<synchronous>, transform_indices = @transform_7, window_bounds = array<i64: 32, 64>}, {pipeline_mode = #tpu.pipeline_mode<synchronous>, transform_indices = @transform_8, window_bounds = array<i64: 1, 64>}, {pipeline_mode = #tpu.pipeline_mode<synchronous>, transform_indices = @transform_9, window_bounds = array<i64: 64, 32>}, {pipeline_mode = #tpu.pipeline_mode<synchronous>, transform_indices = @transform_10, window_bounds = array<i64: 1, 32>}, {pipeline_mode = #tpu.pipeline_mode<synchronous>, transform_indices = @transform_11, window_bounds = array<i64: 32, 96>}, {pipeline_mode = #tpu.pipeline_mode<synchronous>, transform_indices = @transform_12, window_bounds = array<i64: 1, 96>}, {pipeline_mode = #tpu.pipeline_mode<synchronous>, transform_indices = @transform_13, window_bounds = array<i64: 32, 32>}, {pipeline_mode = #tpu.pipeline_mode<synchronous>, transform_indices = @transform_14, window_bounds = array<i64: 1, 32>}, {transform_indices = @transform_15, window_bounds = array<i64: 1, 2, 128>}]} {
    %c0 = arith.constant 0 : index
    %c0_0 = arith.constant 0 : index
    %c0_1 = arith.constant 0 : index
    %0 = vector.load %arg1[%c0, %c0_0, %c0_1] : memref<1x32x32xf32, #tpu.memory_space<vmem>>, vector<1x32x32xf32>
    %1 = vector.shape_cast %0 : vector<1x32x32xf32> to vector<32x32xf32>
    %2 = arith.mulf %1, %1 : vector<32x32xf32>
    %cst = arith.constant dense<0.000000e+00> : vector<32xf32>
    %3 = vector.multi_reduction <add>, %2, %cst [1] : vector<32x32xf32> to vector<32xf32>
    %4 = vector.shape_cast %3 : vector<32xf32> to vector<32x1xf32>
    %5 = math.rsqrt %4 : vector<32x1xf32>
    %6 = vector.broadcast %5 : vector<32x1xf32> to vector<32x32xf32>
    %7 = arith.mulf %1, %6 : vector<32x32xf32>
    %c0_2 = arith.constant 0 : index
    %c0_3 = arith.constant 0 : index
    %8 = vector.load %arg8[%c0_2, %c0_3] : memref<32x64xf32, #tpu.memory_space<vmem>>, vector<32x64xf32>
    %cst_4 = arith.constant dense<0.000000e+00> : vector<32x64xf32>
    %9 = tpu.matmul %7, %8, %cst_4 {dimension_numbers = #tpu.dot_dimension_numbers<[1], [0], [0], [1], [0, 0, 1, 1], [], []>} : vector<32x32xf32>, vector<32x64xf32>, vector<32x64xf32> -> vector<32x64xf32>
    %c0_5 = arith.constant 0 : index
    %c0_6 = arith.constant 0 : index
    %10 = vector.load %arg9[%c0_5, %c0_6] : memref<1x64xf32, #tpu.memory_space<vmem>>, vector<1x64xf32>
    %11 = vector.broadcast %10 : vector<1x64xf32> to vector<32x64xf32>
    %12 = arith.addf %9, %11 : vector<32x64xf32>
    %cst_7 = arith.constant 0.000000e+00 : f32
    %13 = vector.broadcast %cst_7 : f32 to vector<32x64xf32>
    %14 = arith.maximumf %12, %13 : vector<32x64xf32>
    %c0_8 = arith.constant 0 : index
    %c0_9 = arith.constant 0 : index
    %15 = vector.load %arg10[%c0_8, %c0_9] : memref<64x32xf32, #tpu.memory_space<vmem>>, vector<64x32xf32>
    %cst_10 = arith.constant dense<0.000000e+00> : vector<32x32xf32>
    %16 = tpu.matmul %14, %15, %cst_10 {dimension_numbers = #tpu.dot_dimension_numbers<[1], [0], [0], [1], [0, 0, 1, 1], [], []>} : vector<32x64xf32>, vector<64x32xf32>, vector<32x32xf32> -> vector<32x32xf32>
    %c0_11 = arith.constant 0 : index
    %c0_12 = arith.constant 0 : index
    %17 = vector.load %arg11[%c0_11, %c0_12] : memref<1x32xf32, #tpu.memory_space<vmem>>, vector<1x32xf32>
    %18 = vector.broadcast %17 : vector<1x32xf32> to vector<32x32xf32>
    %19 = arith.addf %16, %18 : vector<32x32xf32>
    %cst_13 = arith.constant 0.000000e+00 : f32
    %20 = vector.broadcast %cst_13 : f32 to vector<32x32xf32>
    %21 = arith.maximumf %19, %20 : vector<32x32xf32>
    %c0_14 = arith.constant 0 : index
    %c0_15 = arith.constant 0 : index
    %22 = vector.load %arg12[%c0_14, %c0_15] : memref<32x96xf32, #tpu.memory_space<vmem>>, vector<32x96xf32>
    %cst_16 = arith.constant dense<0.000000e+00> : vector<32x96xf32>
    %23 = tpu.matmul %21, %22, %cst_16 {dimension_numbers = #tpu.dot_dimension_numbers<[1], [0], [0], [1], [0, 0, 1, 1], [], []>} : vector<32x32xf32>, vector<32x96xf32>, vector<32x96xf32> -> vector<32x96xf32>
    %c0_17 = arith.constant 0 : index
    %c0_18 = arith.constant 0 : index
    %24 = vector.load %arg13[%c0_17, %c0_18] : memref<1x96xf32, #tpu.memory_space<vmem>>, vector<1x96xf32>
    %25 = vector.broadcast %24 : vector<1x96xf32> to vector<32x96xf32>
    %26 = arith.addf %23, %25 : vector<32x96xf32>
    %27 = vector.extract_strided_slice %26 {offsets = [0, 0], sizes = [32, 32], strides = [1, 1]} : vector<32x96xf32> to vector<32x32xf32>
    %28 = vector.extract_strided_slice %26 {offsets = [0, 32], sizes = [32, 32], strides = [1, 1]} : vector<32x96xf32> to vector<32x32xf32>
    %29 = vector.extract_strided_slice %26 {offsets = [0, 64], sizes = [32, 32], strides = [1, 1]} : vector<32x96xf32> to vector<32x32xf32>
    %c0_19 = arith.constant 0 : index
    %c0_20 = arith.constant 0 : index
    %30 = vector.load %arg6[%c0_19, %c0_20] : memref<32x128xf32, #tpu.memory_space<vmem>>, vector<32x128xf32>
    %cst_21 = arith.constant dense<0.000000e+00> : vector<32x128xf32>
    %31 = tpu.matmul %27, %30, %cst_21 {dimension_numbers = #tpu.dot_dimension_numbers<[1], [0], [0], [1], [0, 0, 1, 1], [], []>} : vector<32x32xf32>, vector<32x128xf32>, vector<32x128xf32> -> vector<32x128xf32>
    %cst_22 = arith.constant 0.176776692 : f32
    %32 = vector.broadcast %cst_22 : f32 to vector<32x128xf32>
    %33 = arith.mulf %31, %32 : vector<32x128xf32>
    %34 = tpu.iota {dimensions = array<i32: 1>} : vector<1x128xi32>
    %c8_i32 = arith.constant 8 : i32
    %35 = vector.broadcast %c8_i32 : i32 to vector<1x128xi32>
    %36 = arith.cmpi slt, %34, %35 : vector<1x128xi32>
    %cst_23 = arith.constant 0.000000e+00 : f32
    %cst_24 = arith.constant -1.000000e+30 : f32
    %37 = vector.broadcast %cst_23 : f32 to vector<1x128xf32>
    %38 = vector.broadcast %cst_24 : f32 to vector<1x128xf32>
    %39 = arith.select %36, %37, %38 : vector<1x128xi1>, vector<1x128xf32>
    %40 = vector.broadcast %39 : vector<1x128xf32> to vector<32x128xf32>
    %41 = arith.addf %33, %40 : vector<32x128xf32>
    %cst_25 = arith.constant dense<0xFF800000> : vector<32xf32>
    %42 = vector.multi_reduction <maximumf>, %41, %cst_25 [1] : vector<32x128xf32> to vector<32xf32>
    %43 = vector.shape_cast %42 : vector<32xf32> to vector<32x1xf32>
    %44 = vector.broadcast %43 : vector<32x1xf32> to vector<32x128xf32>
    %45 = arith.subf %41, %44 : vector<32x128xf32>
    %46 = math.exp %45 : vector<32x128xf32>
    %cst_26 = arith.constant dense<0.000000e+00> : vector<32xf32>
    %47 = vector.multi_reduction <add>, %46, %cst_26 [1] : vector<32x128xf32> to vector<32xf32>
    %48 = vector.shape_cast %47 : vector<32xf32> to vector<32x1xf32>
    %49 = tpu.reciprocal %48 {approx = true} : vector<32x1xf32> -> vector<32x1xf32>
    %50 = vector.broadcast %49 : vector<32x1xf32> to vector<32x128xf32>
    %51 = arith.mulf %46, %50 : vector<32x128xf32>
    %c0_27 = arith.constant 0 : index
    %c0_28 = arith.constant 0 : index
    %52 = vector.load %arg7[%c0_27, %c0_28] : memref<128x32xf32, #tpu.memory_space<vmem>>, vector<128x32xf32>
    %cst_29 = arith.constant dense<0.000000e+00> : vector<32x32xf32>
    %53 = tpu.matmul %51, %52, %cst_29 {dimension_numbers = #tpu.dot_dimension_numbers<[1], [0], [0], [1], [0, 0, 1, 1], [], []>} : vector<32x128xf32>, vector<128x32xf32>, vector<32x32xf32> -> vector<32x32xf32>
    %c0_30 = arith.constant 0 : index
    %c0_31 = arith.constant 0 : index
    %54 = vector.load %arg14[%c0_30, %c0_31] : memref<32x32xf32, #tpu.memory_space<vmem>>, vector<32x32xf32>
    %cst_32 = arith.constant dense<0.000000e+00> : vector<32x32xf32>
    %55 = tpu.matmul %53, %54, %cst_32 {dimension_numbers = #tpu.dot_dimension_numbers<[1], [0], [0], [1], [0, 0, 1, 1], [], []>} : vector<32x32xf32>, vector<32x32xf32>, vector<32x32xf32> -> vector<32x32xf32>
    %c0_33 = arith.constant 0 : index
    %c0_34 = arith.constant 0 : index
    %56 = vector.load %arg15[%c0_33, %c0_34] : memref<1x32xf32, #tpu.memory_space<vmem>>, vector<1x32xf32>
    %57 = vector.broadcast %56 : vector<1x32xf32> to vector<32x32xf32>
    %58 = arith.addf %55, %57 : vector<32x32xf32>
    %59 = vector.shape_cast %58 : vector<32x32xf32> to vector<2x16x32xf32>
    %cst_35 = arith.constant dense<0.000000e+00> : vector<2x32xf32>
    %60 = vector.multi_reduction <add>, %59, %cst_35 [1] : vector<2x16x32xf32> to vector<2x32xf32>
    %cst_36 = arith.constant 1.600000e+01 : f32
    %61 = vector.broadcast %cst_36 : f32 to vector<2x32xf32>
    %62 = arith.divf %60, %61 : vector<2x32xf32>
    %cst_37 = arith.constant dense<0xFF800000> : vector<2x32xf32>
    %63 = vector.multi_reduction <maximumf>, %59, %cst_37 [1] : vector<2x16x32xf32> to vector<2x32xf32>
    %64 = arith.addf %62, %63 : vector<2x32xf32>
    %c0_38 = arith.constant 0 : index
    %c0_39 = arith.constant 0 : index
    %65 = vector.load %arg5[%c0_38, %c0_39] : memref<32x128xf32, #tpu.memory_space<vmem>>, vector<32x128xf32>
    %cst_40 = arith.constant dense<0.000000e+00> : vector<32x128xf32>
    %66 = tpu.matmul %28, %65, %cst_40 {dimension_numbers = #tpu.dot_dimension_numbers<[1], [0], [0], [1], [0, 0, 1, 1], [], []>} : vector<32x32xf32>, vector<32x128xf32>, vector<32x128xf32> -> vector<32x128xf32>
    %cst_41 = arith.constant 0.176776692 : f32
    %67 = vector.broadcast %cst_41 : f32 to vector<32x128xf32>
    %68 = arith.mulf %66, %67 : vector<32x128xf32>
    %69 = vector.shape_cast %68 : vector<32x128xf32> to vector<2x16x128xf32>
    %cst_42 = arith.constant dense<0xFF800000> : vector<2x128xf32>
    %70 = vector.multi_reduction <maximumf>, %69, %cst_42 [1] : vector<2x16x128xf32> to vector<2x128xf32>
    %71 = vector.shape_cast %70 : vector<2x128xf32> to vector<2x1x128xf32>
    %72 = vector.broadcast %71 : vector<2x1x128xf32> to vector<2x16x128xf32>
    %73 = arith.subf %69, %72 : vector<2x16x128xf32>
    %74 = math.exp %73 : vector<2x16x128xf32>
    %cst_43 = arith.constant dense<0.000000e+00> : vector<2x128xf32>
    %75 = vector.multi_reduction <add>, %74, %cst_43 [1] : vector<2x16x128xf32> to vector<2x128xf32>
    %76 = vector.shape_cast %75 : vector<2x128xf32> to vector<2x1x128xf32>
    %77 = tpu.reciprocal %76 {approx = true} : vector<2x1x128xf32> -> vector<2x1x128xf32>
    %78 = vector.broadcast %77 : vector<2x1x128xf32> to vector<2x16x128xf32>
    %79 = arith.mulf %74, %78 : vector<2x16x128xf32>
    %c0_44 = arith.constant 0 : index
    %c0_45 = arith.constant 0 : index
    %c0_46 = arith.constant 0 : index
    %80 = vector.load %arg3[%c0_44, %c0_45, %c0_46] : memref<1x2x32xf32, #tpu.memory_space<vmem>>, vector<1x2x32xf32>
    %81 = vector.shape_cast %80 : vector<1x2x32xf32> to vector<2x32xf32>
    %82 = vector.shape_cast %29 : vector<32x32xf32> to vector<2x16x32xf32>
    %83 = vector.shape_cast %81 : vector<2x32xf32> to vector<2x1x32xf32>
    %84 = vector.broadcast %83 : vector<2x1x32xf32> to vector<2x16x32xf32>
    %85 = arith.mulf %82, %84 : vector<2x16x32xf32>
    %cst_47 = arith.constant dense<0.000000e+00> : vector<2x16xf32>
    %86 = vector.multi_reduction <add>, %85, %cst_47 [2] : vector<2x16x32xf32> to vector<2x16xf32>
    %87 = vector.shape_cast %86 : vector<2x16xf32> to vector<2x16x1xf32>
    %88 = vector.broadcast %87 : vector<2x16x1xf32> to vector<2x16x128xf32>
    %89 = arith.mulf %79, %88 : vector<2x16x128xf32>
    %cst_48 = arith.constant dense<0.000000e+00> : vector<2x128xf32>
    %90 = vector.multi_reduction <add>, %89, %cst_48 [1] : vector<2x16x128xf32> to vector<2x128xf32>
    %c0_49 = arith.constant 0 : index
    %c0_50 = arith.constant 0 : index
    %c0_51 = arith.constant 0 : index
    %91 = vector.load %arg2[%c0_49, %c0_50, %c0_51] : memref<1x2x32xf32, #tpu.memory_space<vmem>>, vector<1x2x32xf32>
    %92 = vector.shape_cast %91 : vector<1x2x32xf32> to vector<2x32xf32>
    %c0_52 = arith.constant 0 : index
    %c0_53 = arith.constant 0 : index
    %93 = vector.load %arg4[%c0_52, %c0_53] : memref<32x128xf32, #tpu.memory_space<vmem>>, vector<32x128xf32>
    %cst_54 = arith.constant dense<0.000000e+00> : vector<2x128xf32>
    %94 = tpu.matmul %92, %93, %cst_54 {dimension_numbers = #tpu.dot_dimension_numbers<[1], [0], [0], [1], [0, 0, 1, 1], [], []>} : vector<2x32xf32>, vector<32x128xf32>, vector<2x128xf32> -> vector<2x128xf32>
    %c0_55 = arith.constant 0 : index
    %c0_56 = arith.constant 0 : index
    %95 = vector.load %arg4[%c0_55, %c0_56] : memref<32x128xf32, #tpu.memory_space<vmem>>, vector<32x128xf32>
    %cst_57 = arith.constant dense<0.000000e+00> : vector<2x128xf32>
    %96 = tpu.matmul %64, %95, %cst_57 {dimension_numbers = #tpu.dot_dimension_numbers<[1], [0], [0], [1], [0, 0, 1, 1], [], []>} : vector<2x32xf32>, vector<32x128xf32>, vector<2x128xf32> -> vector<2x128xf32>
    %cst_58 = arith.constant 14.2857141 : f32
    %97 = vector.broadcast %cst_58 : f32 to vector<2x128xf32>
    %98 = arith.mulf %97, %94 : vector<2x128xf32>
    %cst_59 = arith.constant 7.14285707 : f32
    %99 = vector.broadcast %cst_59 : f32 to vector<2x128xf32>
    %100 = arith.mulf %99, %90 : vector<2x128xf32>
    %101 = arith.addf %98, %100 : vector<2x128xf32>
    %cst_60 = arith.constant 3.57142854 : f32
    %102 = vector.broadcast %cst_60 : f32 to vector<2x128xf32>
    %103 = arith.mulf %102, %96 : vector<2x128xf32>
    %104 = arith.addf %101, %103 : vector<2x128xf32>
    %c0_61 = arith.constant 0 : index
    %c0_62 = arith.constant 0 : index
    %c0_63 = arith.constant 0 : index
    %105 = vector.load %arg16[%c0_61, %c0_62, %c0_63] : memref<1x2x128xf32, #tpu.memory_space<vmem>>, vector<1x2x128xf32>
    %106 = vector.shape_cast %105 : vector<1x2x128xf32> to vector<2x128xf32>
    %107 = vector.shape_cast %104 : vector<2x128xf32> to vector<1x2x128xf32>
    tpu.vector_store %arg16[%c0_61, %c0_62, %c0_63], %107 {strides = array<i32>} : memref<1x2x128xf32, #tpu.memory_space<vmem>>, vector<1x2x128xf32>,
    return
  }
  func.func @transform_0(%arg0: i32) -> (i32, i32, i32) {
    %c0_i32 = arith.constant 0 : i32
    %c0_i32_0 = arith.constant 0 : i32
    %c0_i32_1 = arith.constant 0 : i32
    return %arg0, %c0_i32, %c0_i32_0 : i32, i32, i32
  }
  func.func @transform_1(%arg0: i32) -> (i32, i32, i32) {
    %c0_i32 = arith.constant 0 : i32
    %c0_i32_0 = arith.constant 0 : i32
    %c0_i32_1 = arith.constant 0 : i32
    return %arg0, %c0_i32, %c0_i32_0 : i32, i32, i32
  }
  func.func @transform_2(%arg0: i32) -> (i32, i32, i32) {
    %c0_i32 = arith.constant 0 : i32
    %c0_i32_0 = arith.constant 0 : i32
    %c0_i32_1 = arith.constant 0 : i32
    return %arg0, %c0_i32, %c0_i32_0 : i32, i32, i32
  }
  func.func @transform_3(%arg0: i32) -> (i32, i32) {
    %c0_i32 = arith.constant 0 : i32
    %c0_i32_0 = arith.constant 0 : i32
    %c0_i32_1 = arith.constant 0 : i32
    return %c0_i32, %c0_i32_0 : i32, i32
  }
  func.func @transform_4(%arg0: i32) -> (i32, i32) {
    %c0_i32 = arith.constant 0 : i32
    %c0_i32_0 = arith.constant 0 : i32
    %c0_i32_1 = arith.constant 0 : i32
    return %c0_i32, %c0_i32_0 : i32, i32
  }
  func.func @transform_5(%arg0: i32) -> (i32, i32) {
    %c0_i32 = arith.constant 0 : i32
    %c0_i32_0 = arith.constant 0 : i32
    %c0_i32_1 = arith.constant 0 : i32
    return %c0_i32, %c0_i32_0 : i32, i32
  }
  func.func @transform_6(%arg0: i32) -> (i32, i32) {
    %c0_i32 = arith.constant 0 : i32
    %c0_i32_0 = arith.constant 0 : i32
    %c0_i32_1 = arith.constant 0 : i32
    return %c0_i32, %c0_i32_0 : i32, i32
  }
  func.func @transform_7(%arg0: i32) -> (i32, i32) {
    %c0_i32 = arith.constant 0 : i32
    %c0_i32_0 = arith.constant 0 : i32
    %c0_i32_1 = arith.constant 0 : i32
    return %c0_i32, %c0_i32_0 : i32, i32
  }
  func.func @transform_8(%arg0: i32) -> (i32, i32) {
    %c0_i32 = arith.constant 0 : i32
    %c0_i32_0 = arith.constant 0 : i32
    %c0_i32_1 = arith.constant 0 : i32
    return %c0_i32, %c0_i32_0 : i32, i32
  }
  func.func @transform_9(%arg0: i32) -> (i32, i32) {
    %c0_i32 = arith.constant 0 : i32
    %c0_i32_0 = arith.constant 0 : i32
    %c0_i32_1 = arith.constant 0 : i32
    return %c0_i32, %c0_i32_0 : i32, i32
  }
  func.func @transform_10(%arg0: i32) -> (i32, i32) {
    %c0_i32 = arith.constant 0 : i32
    %c0_i32_0 = arith.constant 0 : i32
    %c0_i32_1 = arith.constant 0 : i32
    return %c0_i32, %c0_i32_0 : i32, i32
  }
  func.func @transform_11(%arg0: i32) -> (i32, i32) {
    %c0_i32 = arith.constant 0 : i32
    %c0_i32_0 = arith.constant 0 : i32
    %c0_i32_1 = arith.constant 0 : i32
    return %c0_i32, %c0_i32_0 : i32, i32
  }
  func.func @transform_12(%arg0: i32) -> (i32, i32) {
    %c0_i32 = arith.constant 0 : i32
    %c0_i32_0 = arith.constant 0 : i32
    %c0_i32_1 = arith.constant 0 : i32
    return %c0_i32, %c0_i32_0 : i32, i32
  }
  func.func @transform_13(%arg0: i32) -> (i32, i32) {
    %c0_i32 = arith.constant 0 : i32
    %c0_i32_0 = arith.constant 0 : i32
    %c0_i32_1 = arith.constant 0 : i32
    return %c0_i32, %c0_i32_0 : i32, i32
  }
  func.func @transform_14(%arg0: i32) -> (i32, i32) {
    %c0_i32 = arith.constant 0 : i32
    %c0_i32_0 = arith.constant 0 : i32
    %c0_i32_1 = arith.constant 0 : i32
    return %c0_i32, %c0_i32_0 : i32, i32
  }
  func.func @transform_15(%arg0: i32) -> (i32, i32, i32) {
    %c0_i32 = arith.constant 0 : i32
    %c0_i32_0 = arith.constant 0 : i32
    %c0_i32_1 = arith.constant 0 : i32
    return %arg0, %c0_i32, %c0_i32_0 : i32, i32, i32
  }
}

module attributes {stable_mosaic.version = 11 : i64} {
  func.func @calip_fs_kernel(%arg0: i32, %arg1: memref<1x32x32xf32, #tpu.memory_space<vmem>>, %arg2: memref<1x2x32xf32, #tpu.memory_space<vmem>>, %arg3: memref<1x2x32xf32, #tpu.memory_space<vmem>>, %arg4: memref<32x128xf32, #tpu.memory_space<vmem>>, %arg5: memref<32x128xf32, #tpu.memory_space<vmem>>, %arg6: memref<32x128xf32, #tpu.memory_space<vmem>>, %arg7: memref<128x32xf32, #tpu.memory_space<vmem>>, %arg8: memref<32x64xf32, #tpu.memory_space<vmem>>, %arg9: memref<1x64xf32, #tpu.memory_space<vmem>>, %arg10: memref<64x32xf32, #tpu.memory_space<vmem>>, %arg11: memref<1x32xf32, #tpu.memory_space<vmem>>, %arg12: memref<32x96xf32, #tpu.memory_space<vmem>>, %arg13: memref<1x96xf32, #tpu.memory_space<vmem>>, %arg14: memref<32x32xf32, #tpu.memory_space<vmem>>, %arg15: memref<1x32xf32, #tpu.memory_space<vmem>>, %arg16: memref<1x2x128xf32, #tpu.memory_space<vmem>>) attributes {dimension_semantics = [#tpu.dimension_semantics<parallel>], iteration_bounds = array<i64: 2>, scalar_prefetch = 0 : i64, scratch_operands = 0 : i64, tpu.core_type = #tpu.core_type<tc>, window_params = [{transform_indices = @transform_0, window_bounds = array<i64: 1, 32, 32>}, {transform_indices = @transform_1, window_bounds = array<i64: 1, 2, 32>}, {transform_indices = @transform_2, window_bounds = array<i64: 1, 2, 32>}, {pipeline_mode = #tpu.pipeline_mode<synchronous>, transform_indices = @transform_3, window_bounds = array<i64: 32, 128>}, {pipeline_mode = #tpu.pipeline_mode<synchronous>, transform_indices = @transform_4, window_bounds = array<i64: 32, 128>}, {pipeline_mode = #tpu.pipeline_mode<synchronous>, transform_indices = @transform_5, window_bounds = array<i64: 32, 128>}, {pipeline_mode = #tpu.pipeline_mode<synchronous>, transform_indices = @transform_6, window_bounds = array<i64: 128, 32>}, {pipeline_mode = #tpu.pipeline_mode<synchronous>, transform_indices = @transform_7, window_bounds = array<i64: 32, 64>}, {pipeline_mode = #tpu.pipeline_mode<synchronous>, transform_indices = @transform_8, window_bounds = array<i64: 1, 64>}, {pipeline_mode = #tpu.pipeline_mode<synchronous>, transform_indices = @transform_9, window_bounds = array<i64: 64, 32>}, {pipeline_mode = #tpu.pipeline_mode<synchronous>, transform_indices = @transform_10, window_bounds = array<i64: 1, 32>}, {pipeline_mode = #tpu.pipeline_mode<synchronous>, transform_indices = @transform_11, window_bounds = array<i64: 32, 96>}, {pipeline_mode = #tpu.pipeline_mode<synchronous>, transform_indices = @transform_12, window_bounds = array<i64: 1, 96>}, {pipeline_mode = #tpu.pipeline_mode<synchronous>, transform_indices = @transform_13, window_bounds = array<i64: 32, 32>}, {pipeline_mode = #tpu.pipeline_mode<synchronous>, transform_indices = @transform_14, window_bounds = array<i64: 1, 32>}, {transform_indices = @transform_15, window_bounds = array<i64: 1, 2, 128>}]} {
    %c0 = arith.constant 0 : index
    %c0_0 = arith.constant 0 : index
    %c0_1 = arith.constant 0 : index
    %0 = vector.load %arg1[%c0, %c0_0, %c0_1] : memref<1x32x32xf32, #tpu.memory_space<vmem>>, vector<1x32x32xf32>
    %1 = vector.shape_cast %0 : vector<1x32x32xf32> to vector<32x32xf32>
    %2 = arith.mulf %1, %1 : vector<32x32xf32>
    %cst = arith.constant dense<0.000000e+00> : vector<32xf32>
    %3 = vector.multi_reduction <add>, %2, %cst [1] : vector<32x32xf32> to vector<32xf32>
    %4 = vector.shape_cast %3 : vector<32xf32> to vector<32x1xf32>
    %5 = math.rsqrt %4 : vector<32x1xf32>
    %6 = vector.broadcast %5 : vector<32x1xf32> to vector<32x32xf32>
    %7 = arith.mulf %1, %6 : vector<32x32xf32>
    %c0_2 = arith.constant 0 : index
    %c0_3 = arith.constant 0 : index
    %8 = vector.load %arg8[%c0_2, %c0_3] : memref<32x64xf32, #tpu.memory_space<vmem>>, vector<32x64xf32>
    %cst_4 = arith.constant dense<0.000000e+00> : vector<32x64xf32>
    %9 = tpu.matmul %7, %8, %cst_4 {dimension_numbers = #tpu.dot_dimension_numbers<[1], [0], [0], [1], [0, 0, 1, 1], [], []>} : vector<32x32xf32>, vector<32x64xf32>, vector<32x64xf32> -> vector<32x64xf32>
    %c0_5 = arith.constant 0 : index
    %c0_6 = arith.constant 0 : index
    %10 = vector.load %arg9[%c0_5, %c0_6] : memref<1x64xf32, #tpu.memory_space<vmem>>, vector<1x64xf32>
    %11 = vector.broadcast %10 : vector<1x64xf32> to vector<32x64xf32>
    %12 = arith.addf %9, %11 : vector<32x64xf32>
    %cst_7 = arith.constant 0.000000e+00 : f32
    %13 = vector.broadcast %cst_7 : f32 to vector<32x64xf32>
    %14 = arith.maximumf %12, %13 : vector<32x64xf32>
    %c0_8 = arith.constant 0 : index
    %c0_9 = arith.constant 0 : index
    %15 = vector.load %arg10[%c0_8, %c0_9] : memref<64x32xf32, #tpu.memory_space<vmem>>, vector<64x32xf32>
    %cst_10 = arith.constant dense<0.000000e+00> : vector<32x32xf32>
    %16 = tpu.matmul %14, %15, %cst_10 {dimension_numbers = #tpu.dot_dimension_numbers<[1], [0], [0], [1], [0, 0, 1, 1], [], []>} : vector<32x64xf32>, vector<64x32xf32>, vector<32x32xf32> -> vector<32x32xf32>
    %c0_11 = arith.constant 0 : index
    %c0_12 = arith.constant 0 : index
    %17 = vector.load %arg11[%c0_11, %c0_12] : memref<1x32xf32, #tpu.memory_space<vmem>>, vector<1x32xf32>
    %18 = vector.broadcast %17 : vector<1x32xf32> to vector<32x32xf32>
    %19 = arith.addf %16, %18 : vector<32x32xf32>
    %cst_13 = arith.constant 0.000000e+00 : f32
    %20 = vector.broadcast %cst_13 : f32 to vector<32x32xf32>
    %21 = arith.maximumf %19, %20 : vector<32x32xf32>
    %c0_14 = arith.constant 0 : index
    %c0_15 = arith.constant 0 : index
    %22 = vector.load %arg12[%c0_14, %c0_15] : memref<32x96xf32, #tpu.memory_space<vmem>>, vector<32x96xf32>
    %cst_16 = arith.constant dense<0.000000e+00> : vector<32x96xf32>
    %23 = tpu.matmul %21, %22, %cst_16 {dimension_numbers = #tpu.dot_dimension_numbers<[1], [0], [0], [1], [0, 0, 1, 1], [], []>} : vector<32x32xf32>, vector<32x96xf32>, vector<32x96xf32> -> vector<32x96xf32>
    %c0_17 = arith.constant 0 : index
    %c0_18 = arith.constant 0 : index
    %24 = vector.load %arg13[%c0_17, %c0_18] : memref<1x96xf32, #tpu.memory_space<vmem>>, vector<1x96xf32>
    %25 = vector.broadcast %24 : vector<1x96xf32> to vector<32x96xf32>
    %26 = arith.addf %23, %25 : vector<32x96xf32>
    %27 = vector.extract_strided_slice %26 {offsets = [0, 0], sizes = [32, 32], strides = [1, 1]} : vector<32x96xf32> to vector<32x32xf32>
    %28 = vector.extract_strided_slice %26 {offsets = [0, 32], sizes = [32, 32], strides = [1, 1]} : vector<32x96xf32> to vector<32x32xf32>
    %29 = vector.extract_strided_slice %26 {offsets = [0, 64], sizes = [32, 32], strides = [1, 1]} : vector<32x96xf32> to vector<32x32xf32>
    %c0_19 = arith.constant 0 : index
    %c0_20 = arith.constant 0 : index
    %30 = vector.load %arg6[%c0_19, %c0_20] : memref<32x128xf32, #tpu.memory_space<vmem>>, vector<32x128xf32>
    %cst_21 = arith.constant dense<0.000000e+00> : vector<32x128xf32>
    %31 = tpu.matmul %27, %30, %cst_21 {dimension_numbers = #tpu.dot_dimension_numbers<[1], [0], [0], [1], [0, 0, 1, 1], [], []>} : vector<32x32xf32>, vector<32x128xf32>, vector<32x128xf32> -> vector<32x128xf32>
    %cst_22 = arith.constant 0.176776692 : f32
    %32 = vector.broadcast %cst_22 : f32 to vector<32x128xf32>
    %33 = arith.mulf %31, %32 : vector<32x128xf32>
    %34 = tpu.iota {dimensions = array<i32: 1>} : vector<1x128xi32>
    %c8_i32 = arith.constant 8 : i32
    %35 = vector.broadcast %c8_i32 : i32 to vector<1x128xi32>
    %36 = arith.cmpi slt, %34, %35 : vector<1x128xi32>
    %cst_23 = arith.constant 0.000000e+00 : f32
    %cst_24 = arith.constant -1.000000e+30 : f32
    %37 = vector.broadcast %cst_23 : f32 to vector<1x128xf32>
    %38 = vector.broadcast %cst_24 : f32 to vector<1x128xf32>
    %39 = arith.select %36, %37, %38 : vector<1x128xi1>, vector<1x128xf32>
    %40 = vector.broadcast %39 : vector<1x128xf32> to vector<32x128xf32>
    %41 = arith.addf %33, %40 : vector<32x128xf32>
    %cst_25 = arith.constant dense<0xFF800000> : vector<32xf32>
    %42 = vector.multi_reduction <maximumf>, %41, %cst_25 [1] : vector<32x128xf32> to vector<32xf32>
    %43 = vector.shape_cast %42 : vector<32xf32> to vector<32x1xf32>
    %44 = vector.broadcast %43 : vector<32x1xf32> to vector<32x128xf32>
    %45 = arith.subf %41, %44 : vector<32x128xf32>
    %46 = math.exp %45 : vector<32x128xf32>
    %cst_26 = arith.constant dense<0.000000e+00> : vector<32xf32>
    %47 = vector.multi_reduction <add>, %46, %cst_26 [1] : vector<32x128xf32> to vector<32xf32>
    %48 = vector.shape_cast %47 : vector<32xf32> to vector<32x1xf32>
    %49 = tpu.reciprocal %48 {approx = true} : vector<32x1xf32> -> vector<32x1xf32>
    %50 = vector.broadcast %49 : vector<32x1xf32> to vector<32x128xf32>
    %51 = arith.mulf %46, %50 : vector<32x128xf32>
    %c0_27 = arith.constant 0 : index
    %c0_28 = arith.constant 0 : index
    %52 = vector.load %arg7[%c0_27, %c0_28] : memref<128x32xf32, #tpu.memory_space<vmem>>, vector<128x32xf32>
    %cst_29 = arith.constant dense<0.000000e+00> : vector<32x32xf32>
    %53 = tpu.matmul %51, %52, %cst_29 {dimension_numbers = #tpu.dot_dimension_numbers<[1], [0], [0], [1], [0, 0, 1, 1], [], []>} : vector<32x128xf32>, vector<128x32xf32>, vector<32x32xf32> -> vector<32x32xf32>
    %c0_30 = arith.constant 0 : index
    %c0_31 = arith.constant 0 : index
    %54 = vector.load %arg14[%c0_30, %c0_31] : memref<32x32xf32, #tpu.memory_space<vmem>>, vector<32x32xf32>
    %cst_32 = arith.constant dense<0.000000e+00> : vector<32x32xf32>
    %55 = tpu.matmul %53, %54, %cst_32 {dimension_numbers = #tpu.dot_dimension_numbers<[1], [0], [0], [1], [0, 0, 1, 1], [], []>} : vector<32x32xf32>, vector<32x32xf32>, vector<32x32xf32> -> vector<32x32xf32>
    %c0_33 = arith.constant 0 : index
    %c0_34 = arith.constant 0 : index
    %56 = vector.load %arg15[%c0_33, %c0_34] : memref<1x32xf32, #tpu.memory_space<vmem>>, vector<1x32xf32>
    %57 = vector.broadcast %56 : vector<1x32xf32> to vector<32x32xf32>
    %58 = arith.addf %55, %57 : vector<32x32xf32>
    %59 = vector.shape_cast %58 : vector<32x32xf32> to vector<2x16x32xf32>
    %cst_35 = arith.constant dense<0.000000e+00> : vector<2x32xf32>
    %60 = vector.multi_reduction <add>, %59, %cst_35 [1] : vector<2x16x32xf32> to vector<2x32xf32>
    %cst_36 = arith.constant 1.600000e+01 : f32
    %61 = vector.broadcast %cst_36 : f32 to vector<2x32xf32>
    %62 = arith.divf %60, %61 : vector<2x32xf32>
    %cst_37 = arith.constant dense<0xFF800000> : vector<2x32xf32>
    %63 = vector.multi_reduction <maximumf>, %59, %cst_37 [1] : vector<2x16x32xf32> to vector<2x32xf32>
    %64 = arith.addf %62, %63 : vector<2x32xf32>
    %c0_38 = arith.constant 0 : index
    %c0_39 = arith.constant 0 : index
    %65 = vector.load %arg5[%c0_38, %c0_39] : memref<32x128xf32, #tpu.memory_space<vmem>>, vector<32x128xf32>
    %cst_40 = arith.constant dense<0.000000e+00> : vector<32x128xf32>
    %66 = tpu.matmul %28, %65, %cst_40 {dimension_numbers = #tpu.dot_dimension_numbers<[1], [0], [0], [1], [0, 0, 1, 1], [], []>} : vector<32x32xf32>, vector<32x128xf32>, vector<32x128xf32> -> vector<32x128xf32>
    %cst_41 = arith.constant 0.176776692 : f32
    %67 = vector.broadcast %cst_41 : f32 to vector<32x128xf32>
    %68 = arith.mulf %66, %67 : vector<32x128xf32>
    %69 = vector.shape_cast %68 : vector<32x128xf32> to vector<2x16x128xf32>
    %cst_42 = arith.constant dense<0xFF800000> : vector<2x128xf32>
    %70 = vector.multi_reduction <maximumf>, %69, %cst_42 [1] : vector<2x16x128xf32> to vector<2x128xf32>
    %71 = vector.shape_cast %70 : vector<2x128xf32> to vector<2x1x128xf32>
    %72 = vector.broadcast %71 : vector<2x1x128xf32> to vector<2x16x128xf32>
    %73 = arith.subf %69, %72 : vector<2x16x128xf32>
    %74 = math.exp %73 : vector<2x16x128xf32>
    %cst_43 = arith.constant dense<0.000000e+00> : vector<2x128xf32>
    %75 = vector.multi_reduction <add>, %74, %cst_43 [1] : vector<2x16x128xf32> to vector<2x128xf32>
    %76 = vector.shape_cast %75 : vector<2x128xf32> to vector<2x1x128xf32>
    %77 = tpu.reciprocal %76 {approx = true} : vector<2x1x128xf32> -> vector<2x1x128xf32>
    %78 = vector.broadcast %77 : vector<2x1x128xf32> to vector<2x16x128xf32>
    %79 = arith.mulf %74, %78 : vector<2x16x128xf32>
    %c0_44 = arith.constant 0 : index
    %c0_45 = arith.constant 0 : index
    %c0_46 = arith.constant 0 : index
    %80 = vector.load %arg3[%c0_44, %c0_45, %c0_46] : memref<1x2x32xf32, #tpu.memory_space<vmem>>, vector<1x2x32xf32>
    %81 = vector.shape_cast %80 : vector<1x2x32xf32> to vector<2x32xf32>
    %82 = vector.shape_cast %29 : vector<32x32xf32> to vector<2x16x32xf32>
    %83 = vector.shape_cast %81 : vector<2x32xf32> to vector<2x1x32xf32>
    %84 = vector.broadcast %83 : vector<2x1x32xf32> to vector<2x16x32xf32>
    %85 = arith.mulf %82, %84 : vector<2x16x32xf32>
    %cst_47 = arith.constant dense<0.000000e+00> : vector<2x16xf32>
    %86 = vector.multi_reduction <add>, %85, %cst_47 [2] : vector<2x16x32xf32> to vector<2x16xf32>
    %87 = vector.shape_cast %86 : vector<2x16xf32> to vector<2x16x1xf32>
    %88 = vector.broadcast %87 : vector<2x16x1xf32> to vector<2x16x128xf32>
    %89 = arith.mulf %79, %88 : vector<2x16x128xf32>
    %cst_48 = arith.constant dense<0.000000e+00> : vector<2x128xf32>
    %90 = vector.multi_reduction <add>, %89, %cst_48 [1] : vector<2x16x128xf32> to vector<2x128xf32>
    %c0_49 = arith.constant 0 : index
    %c0_50 = arith.constant 0 : index
    %c0_51 = arith.constant 0 : index
    %91 = vector.load %arg2[%c0_49, %c0_50, %c0_51] : memref<1x2x32xf32, #tpu.memory_space<vmem>>, vector<1x2x32xf32>
    %92 = vector.shape_cast %91 : vector<1x2x32xf32> to vector<2x32xf32>
    %c0_52 = arith.constant 0 : index
    %c0_53 = arith.constant 0 : index
    %93 = vector.load %arg4[%c0_52, %c0_53] : memref<32x128xf32, #tpu.memory_space<vmem>>, vector<32x128xf32>
    %cst_54 = arith.constant dense<0.000000e+00> : vector<2x128xf32>
    %94 = tpu.matmul %92, %93, %cst_54 {dimension_numbers = #tpu.dot_dimension_numbers<[1], [0], [0], [1], [0, 0, 1, 1], [], []>} : vector<2x32xf32>, vector<32x128xf32>, vector<2x128xf32> -> vector<2x128xf32>
    %c0_55 = arith.constant 0 : index
    %c0_56 = arith.constant 0 : index
    %95 = vector.load %arg4[%c0_55, %c0_56] : memref<32x128xf32, #tpu.memory_space<vmem>>, vector<32x128xf32>
    %cst_57 = arith.constant dense<0.000000e+00> : vector<2x128xf32>
    %96 = tpu.matmul %64, %95, %cst_57 {dimension_numbers = #tpu.dot_dimension_numbers<[1], [0], [0], [1], [0, 0, 1, 1], [], []>} : vector<2x32xf32>, vector<32x128xf32>, vector<2x128xf32> -> vector<2x128xf32>
    %cst_58 = arith.constant 14.2857141 : f32
    %97 = vector.broadcast %cst_58 : f32 to vector<2x128xf32>
    %98 = arith.mulf %97, %94 : vector<2x128xf32>
    %cst_59 = arith.constant 7.14285707 : f32
    %99 = vector.broadcast %cst_59 : f32 to vector<2x128xf32>
    %100 = arith.mulf %99, %90 : vector<2x128xf32>
    %101 = arith.addf %98, %100 : vector<2x128xf32>
    %cst_60 = arith.constant 3.57142854 : f32
    %102 = vector.broadcast %cst_60 : f32 to vector<2x128xf32>
    %103 = arith.mulf %102, %96 : vector<2x128xf32>
    %104 = arith.addf %101, %103 : vector<2x128xf32>
    %c0_61 = arith.constant 0 : index
    %c0_62 = arith.constant 0 : index
    %c0_63 = arith.constant 0 : index
    %105 = vector.load %arg16[%c0_61, %c0_62, %c0_63] : memref<1x2x128xf32, #tpu.memory_space<vmem>>, vector<1x2x128xf32>
    %106 = vector.shape_cast %105 : vector<1x2x128xf32> to vector<2x128xf32>
    %107 = vector.shape_cast %104 : vector<2x128xf32> to vector<1x2x128xf32>
    tpu.vector_store %arg16[%c0_61, %c0_62, %c0_63], %107 {strides = array<i32>} : memref<1x2x128xf32, #tpu.memory_space<vmem>>, vector<1x2x128xf32>,
    return
  }
  func.func @transform_0(%arg0: i32) -> (i32, i32, i32) {
    %c0_i32 = arith.constant 0 : i32
    %c0_i32_0 = arith.constant 0 : i32
    %c0_i32_1 = arith.constant 0 : i32
    return %arg0, %c0_i32, %c0_i32_0 : i32, i32, i32
  }
  func.func @transform_1(%arg0: i32) -> (i32, i32, i32) {
    %c0_i32 = arith.constant 0 : i32
    %c0_i32_0 = arith.constant 0 : i32
    %c0_i32_1 = arith.constant 0 : i32
    return %arg0, %c0_i32, %c0_i32_0 : i32, i32, i32
  }
  func.func @transform_2(%arg0: i32) -> (i32, i32, i32) {
    %c0_i32 = arith.constant 0 : i32
    %c0_i32_0 = arith.constant 0 : i32
    %c0_i32_1 = arith.constant 0 : i32
    return %arg0, %c0_i32, %c0_i32_0 : i32, i32, i32
  }
  func.func @transform_3(%arg0: i32) -> (i32, i32) {
    %c0_i32 = arith.constant 0 : i32
    %c0_i32_0 = arith.constant 0 : i32
    %c0_i32_1 = arith.constant 0 : i32
    return %c0_i32, %c0_i32_0 : i32, i32
  }
  func.func @transform_4(%arg0: i32) -> (i32, i32) {
    %c0_i32 = arith.constant 0 : i32
    %c0_i32_0 = arith.constant 0 : i32
    %c0_i32_1 = arith.constant 0 : i32
    return %c0_i32, %c0_i32_0 : i32, i32
  }
  func.func @transform_5(%arg0: i32) -> (i32, i32) {
    %c0_i32 = arith.constant 0 : i32
    %c0_i32_0 = arith.constant 0 : i32
    %c0_i32_1 = arith.constant 0 : i32
    return %c0_i32, %c0_i32_0 : i32, i32
  }
  func.func @transform_6(%arg0: i32) -> (i32, i32) {
    %c0_i32 = arith.constant 0 : i32
    %c0_i32_0 = arith.constant 0 : i32
    %c0_i32_1 = arith.constant 0 : i32
    return %c0_i32, %c0_i32_0 : i32, i32
  }
  func.func @transform_7(%arg0: i32) -> (i32, i32) {
    %c0_i32 = arith.constant 0 : i32
    %c0_i32_0 = arith.constant 0 : i32
    %c0_i32_1 = arith.constant 0 : i32
    return %c0_i32, %c0_i32_0 : i32, i32
  }
  func.func @transform_8(%arg0: i32) -> (i32, i32) {
    %c0_i32 = arith.constant 0 : i32
    %c0_i32_0 = arith.constant 0 : i32
    %c0_i32_1 = arith.constant 0 : i32
    return %c0_i32, %c0_i32_0 : i32, i32
  }
  func.func @transform_9(%arg0: i32) -> (i32, i32) {
    %c0_i32 = arith.constant 0 : i32
    %c0_i32_0 = arith.constant 0 : i32
    %c0_i32_1 = arith.constant 0 : i32
    return %c0_i32, %c0_i32_0 : i32, i32
  }
  func.func @transform_10(%arg0: i32) -> (i32, i32) {
    %c0_i32 = arith.constant 0 : i32
    %c0_i32_0 = arith.constant 0 : i32
    %c0_i32_1 = arith.constant 0 : i32
    return %c0_i32, %c0_i32_0 : i32, i32
  }
  func.func @transform_11(%arg0: i32) -> (i32, i32) {
    %c0_i32 = arith.constant 0 : i32
    %c0_i32_0 = arith.constant 0 : i32
    %c0_i32_1 = arith.constant 0 : i32
    return %c0_i32, %c0_i32_0 : i32, i32
  }
  func.func @transform_12(%arg0: i32) -> (i32, i32) {
    %c0_i32 = arith.constant 0 : i32
    %c0_i32_0 = arith.constant 0 : i32
    %c0_i32_1 = arith.constant 0 : i32
    return %c0_i32, %c0_i32_0 : i32, i32
  }
  func.func @transform_13(%arg0: i32) -> (i32, i32) {
    %c0_i32 = arith.constant 0 : i32
    %c0_i32_0 = arith.constant 0 : i32
    %c0_i32_1 = arith.constant 0 : i32
    return %c0_i32, %c0_i32_0 : i32, i32
  }
  func.func @transform_14(%arg0: i32) -> (i32, i32) {
    %c0_i32 = arith.constant 0 : i32
    %c0_i32_0 = arith.constant 0 : i32
    %c0_i32_1 = arith.constant 0 : i32
    return %c0_i32, %c0_i32_0 : i32, i32
  }
  func.func @transform_15(%arg0: i32) -> (i32, i32, i32) {
    %c0_i32 = arith.constant 0 : i32
    %c0_i32_0 = arith.constant 0 : i32
    %c0_i32_1 = arith.constant 0 : i32
    return %arg0, %c0_i32, %c0_i32_0 : i32, i32, i32
  }
}

</mosaic_0001>

<bundles_post_ra>
// kernel: tpu_custom_call.1
= control target key start
LH: loop header
LB: loop body
LE: loop exit
PB: predicated region body
PF: predicated region fallthrough
CT: control target
= control target key end

     0   :  { %s2913_s0 = inlined_call_operand.vmem [shape: f32[2,32,32], index: 0, kind: input, shape index: {}]   ;;  %s2914_s1 = inlined_call_operand.hbm [shape: f32[2,2,32], index: 1, kind: input, shape index: {}]   ;;  %s2915_s2 = inlined_call_operand.hbm [shape: f32[2,2,32], index: 2, kind: input, shape index: {}]   ;;  %s2916_s3 = inlined_call_operand.vmem [shape: f32[32,128], index: 3, kind: input, shape index: {}]   ;;  %s2917_s4 = inlined_call_operand.vmem [shape: f32[32,128], index: 4, kind: input, shape index: {}]   ;;  %s2918_s5 = inlined_call_operand.vmem [shape: f32[32,128], index: 5, kind: input, shape index: {}]   ;;  %s2919_s6 = inlined_call_operand.vmem [shape: f32[128,32], index: 6, kind: input, shape index: {}]   ;;  %s2920_s7 = inlined_call_operand.vmem [shape: f32[32,64], index: 7, kind: input, shape index: {}]   ;;  %s2921_s8 = inlined_call_operand.vmem [shape: f32[1,64], index: 8, kind: input, shape index: {}]   ;;  %s2922_s9 = inlined_call_operand.vmem [shape: f32[64,32], index: 9, kind: input, shape index: {}]   ;;  %s2923_s10 = inlined_call_operand.vmem [shape: f32[1,32], index: 10, kind: input, shape index: {}]   ;;  %s2924_s11 = inlined_call_operand.vmem [shape: f32[32,96], index: 11, kind: input, shape index: {}]   ;;  %s2925_s12 = inlined_call_operand.vmem [shape: f32[1,96], index: 12, kind: input, shape index: {}]   ;;  %s2926_s13 = inlined_call_operand.vmem [shape: f32[32,32], index: 13, kind: input, shape index: {}]   ;;  %s2927_s14 = inlined_call_operand.vmem [shape: f32[1,32], index: 14, kind: input, shape index: {}]   ;;  %s2928_s15 = inlined_call_operand.hbm [shape: f32[2,2,128], index: 15, kind: output, shape index: {}]  }
   0x1   :  { %2941 = sst [smem:[#allocation17_spill]] %s2914_s1 }
   0x2   :  { %2942 = sst [smem:[#allocation18_spill]] %s2927_s14 }
   0x3   :  { %2943 = sst [smem:[#allocation19_spill]] %s2928_s15 }
   0x4   :  { %20 = vsyncpa [#allocation3], 0 }
   0x5   :  { %22 = vsyncpa [#allocation3 + $0x1], 0 }
   0x6   :  { %23 = vsyncpa [#allocation6], 0 }
   0x7   :  { %25 = vsyncpa [#allocation6 + $0x1], 0 }
   0x8   :  { %26 = vsyncpa [#allocation4], 0 }
   0x9   :  { %28 = vsyncpa [#allocation4 + $0x1], 0  ;;  %s2450_s18 = smov 0   ;;  %s2452_s19 = smov 0  }
   0xa   :  { %s2454_s20 = smov 0   ;;  %s2456_s21 = smov 0  }
   0xb LB: > { %2944 = sst [smem:[#allocation11_spill]] %s2347_s18  ;;  %s2471_s22 = sadd.s32 4294967295, %s2359_s21   ;;  %s2359_s21 = sphi %s2456_s21, %s2971_s21   ;;  %s2355_s20 = sphi %s2454_s20, %s2973_s20   ;;  %s2351_s19 = sphi %s2452_s19, %s2975_s19   ;;  %s2347_s18 = sphi %s2450_s18, %s2974_s18  }
   0xc   : > { %2945 = sst [smem:[#allocation12_spill]] %s2355_s20  ;;  %s1859_s23 = sadd.s32 4294967294, %s2359_s21  }
   0xd   : > { %s2475_s24 = sadd.s32 1, %s2359_s21   ;;  %s67_s25 = sadd.s32 1, %s2355_s20 }
   0xe   : > { %2946 = sst [smem:[#allocation13_spill]] %s2475_s24  ;;  %s64_s26 = ssub.s32 %s2359_s21, %s2475_s24 }
   0xf   : > { %p74_p0 = scmp.ne.s32.totalorder %s2355_s20, %s2351_s19  ;;  %p65_p1 = scmp.eq.s32.totalorder %s64_s26, 0 }
  0x10   : > { %p75_p2 = scmp.eq.s32.totalorder %s2359_s21, 0  ;;  %p80_p3 = scmp.ne.s32.totalorder %s2351_s19, %s2347_s18 }
  0x11   : > { %p81_p4 = scmp.eq.s32.totalorder %s2471_s22, 0  ;;  %p382_p7 = scmp.eq.s32.totalorder %s2471_s22, 1 }
  0x12   : > { %s2487_s27 = scalar_select %p65_p1, %s2355_s20, %s67_s25  }
  0x13   : > { %p2489_p5 = por %p75_p2, %p74_p0  ;;  %p2493_p6 = por %p81_p4, %p80_p3 }
  0x14   : > { %2947 = sst [smem:[#allocation14_spill]] %s2487_s27  ;;  %p388_p8 = scmp.eq.s32.totalorder %s1859_s23, 1 }
  0x15   : > { %s2949_s29 = scalar_select %p2493_p6, 1, 0 }
  0x16   : > { %p2159_p10 = scmp.lt.s32.totalorder %s2359_s21, 2  ;;  %p2500_p11 = por %p382_p7, %p74_p0 }
  0x17   : > { %p2504_p12 = por %p388_p8, %p80_p3  ;;  %s2509_s17 = sand.u32 1, %s2355_s20  }
  0x18   : > { %s2950_s30 = scalar_select %p2500_p11, 1, 0 }
  0x19   : > { %s2952_s16 = scalar_select %p2504_p12, 1, 0 }
  0x1a   : > { %2951 = sst [smem:[#allocation15_spill]] %s2950_s30  ;;  %s2935_s25 = sshll.u32 %s2359_s21, 5 }
  0x1b   : > { %2953 = sst [smem:[#allocation16_spill]] %s2952_s16  ;;  %s2934_s26 = sshll.u32 %s2509_s17, 1 }
  0x1c   : > { %s2954_s1 = sld [smem:[#allocation17_spill]]  ;;  %s456_s18 = scalar_lea.vmem [#allocation2], %s2934_s26 }
  0x1d   : > { %s463_s15 = sshll.u32 %s456_s18, 4  ;;  %p2524_p13 = pnand %p2159_p10, %p2489_p5  ;;  %s2528_s15 = int_to_ptr.vmem [resolvable:$true] %s463_s15 }
  0x1e   : > { %s453_s27 = scalar_lea.sflag [#allocation3], %s2509_s17 }
  0x1f   : > { %p2237_p3 = pneg %p2524_p13 }
  0x22   : > { %s2518_s24 = scalar_lea.hbm %s2954_s1, %s2935_s25  ;;  %s2240_s26 = scalar_lea.hbm %s2954_s1, 64 }
  0x23   : > { %s2235_s23 = scalar_lea.hbm %s2518_s24, 32  ;;  %p2241_p5 = scmp.lt.s32.totalorder %s2518_s24, %s2954_s1 }
  0x24   : > { %p2236_p2 = scmp.ne.s32.totalorder %s2518_s24, %s2235_s23  ;;  %p2242_p8 = scmp.lt.s32.totalorder %s2240_s26, %s2235_s23 }
  0x26   : > { %p2238_p4 = pnand %p2237_p3, %p2236_p2  ;;  %p2243_p10 = por %p2242_p8, %p2241_p5 }
  0x28   : > { %p2239_p7 = pneg %p2238_p4 }
  0x2a   : > { %p2244_p9 = pnand %p2243_p10, %p2239_p7 }
  0x2c   : > { %2247 = shalt.err (!%p2244_p9)
}
  0x2d   : > { %s2248_s30 = scalar_lea.vmem %s2528_s15, 32  ;;  %s2361_s18 = smov [#allocation2]  }
  0x2e   : > { %p2249_p0 = scmp.ne.s32.totalorder %s2528_s15, %s2248_s30  ;;  %s2253_s28 = sshll.u32 %s2361_s18, 4  ;;  %s2254_s28 = int_to_ptr.vmem [resolvable:$false] %s2253_s28 }
  0x2f   : > { %s2255_s14 = scalar_lea.vmem %s2254_s28, 64  ;;  %p2256_p1 = scmp.lt.s32.totalorder %s2528_s15, %s2254_s28 }
  0x30   : > { %p2251_p2 = pnand %p2249_p0, %p2237_p3  ;;  %p2257_p12 = scmp.lt.s32.totalorder %s2255_s14, %s2248_s30 }
  0x32   : > { %p2252_p4 = pneg %p2251_p2  ;;  %p2258_p11 = por %p2257_p12, %p2256_p1 }
  0x34   : > { %p2259_p5 = pnand %p2258_p11, %p2252_p4 }
  0x36   : > { %2262 = shalt.err (!%p2259_p5)
}
  0x37   : > { %2151 = dma.hbm_to_vmem [thread:$0]  (!%p2524_p13), %s2518_s24, 32, %s2528_s15, %s453_s27  }
  0x38   : > { %p2956_p9 = scmp.lt.s32.totalorder %s2359_s21, 3  ;;  %p2957_p0 = scmp.ge.s32.totalorder %s2359_s21, 1 }
  0x39   : > { %s2959_s14 = sshll.u32 %s2359_s21, 5  ;;  %s2960_s23 = sshll.u32 %s2509_s17, 1 }
  0x3a   : > { %p2561_p7 = pnand %p2957_p0, %p2956_p9  ;;  %s2570_s26 = scalar_lea.hbm %s2915_s2, %s2959_s14 }
  0x3b   : > { %s474_s18 = scalar_lea.vmem [#allocation5], %s2960_s23  ;;  %s471_s15 = scalar_lea.sflag [#allocation6], %s2509_s17 }
  0x3c   : > { %s2958_s16 = scalar_select %p2561_p7, 1, 0 }
  0x3d   : > { %s481_s28 = sshll.u32 %s474_s18, 4  ;;  %s2263_s24 = scalar_lea.hbm %s2570_s26, 32  ;;  %s482_s28 = int_to_ptr.vmem [resolvable:$true] %s481_s28 }
  0x3e   : > { %p2264_p11 = scmp.ne.s32.totalorder %s2570_s26, %s2263_s24  ;;  %s2268_s30 = scalar_lea.hbm %s2915_s2, 64 }
  0x3f   : > { %p2269_p8 = scmp.lt.s32.totalorder %s2570_s26, %s2915_s2  ;;  %p2270_p10 = scmp.lt.s32.totalorder %s2268_s30, %s2263_s24 }
  0x40   : > { %p2266_p12 = pnand %p2264_p11, %p2237_p3 }
  0x41   : > { %p2271_p2 = por %p2270_p10, %p2269_p8 }
  0x42   : > { %p2267_p1 = pneg %p2266_p12 }
  0x44   : > { %p2272_p4 = pnand %p2271_p2, %p2267_p1 }
  0x46   : > { %2275 = shalt.err (!%p2272_p4)
}
  0x47   : > { %s2276_s23 = scalar_lea.vmem %s482_s28, 32  ;;  %s2362_s17 = smov [#allocation5]  }
  0x48   : > { %p2277_p5 = scmp.ne.s32.totalorder %s482_s28, %s2276_s23  ;;  %s2281_s18 = sshll.u32 %s2362_s17, 4  ;;  %s2282_s18 = int_to_ptr.vmem [resolvable:$false] %s2281_s18 }
  0x49   : > { %s2283_s1 = scalar_lea.vmem %s2282_s18, 64  ;;  %p2284_p11 = scmp.lt.s32.totalorder %s482_s28, %s2282_s18 }
  0x4a   : > { %p2279_p9 = pnand %p2277_p5, %p2237_p3  ;;  %p2285_p12 = scmp.lt.s32.totalorder %s2283_s1, %s2276_s23 }
  0x4c   : > { %p2280_p0 = pneg %p2279_p9  ;;  %p2286_p6 = por %p2285_p12, %p2284_p11 }
  0x4e   : > { %p2287_p7 = pnand %p2286_p6, %p2280_p0 }
  0x50   : > { %2290 = shalt.err (!%p2287_p7)
}
  0x51   : > { %2154 = dma.hbm_to_vmem [thread:$0]  (!%p2524_p13), %s2570_s26, 32, %s482_s28, %s471_s15  }
  0x52   : > { %p2961_p1 = scmp.ne.s32.totalorder %s2958_s16, 0 }
  0x53   : > { %s2596_s24 = sand.u32 (!%p2961_p1), 1, %s2351_s19   ;;  %p2962_p6 = scmp.ne.s32.totalorder (!%p2961_p1), %s2949_s29, 0 }
  0x54   : > { %490 = sbr.rel (%p2961_p1) target bundleno = 1995 (0x7cb), region = 80  ;;  %s2599_s27 = sshll.u32 (!%p2961_p1), %s2596_s24, 1 }
  0x55   : > { %s493_s30 = scalar_lea.sflag (!%p2961_p1), [#allocation3], %s2596_s24  ;;  %s496_s14 = scalar_lea.vmem (!%p2961_p1), [#allocation2], %s2599_s27 }
  0x59   : > { %2334 = dma.done.wait (%p2962_p6), %s493_s30, 32  }
  0x5a   : > { %2336 = vsyncadd (%p2962_p6), %s493_s30, 4294967264  ;;  %s502_s20 = scalar_lea.sflag [#allocation6], %s2596_s24  ;;  %s505_s16 = scalar_lea.vmem [#allocation5], %s2599_s27 }
  0x5b   : > { %2338 = dma.done.wait (%p2962_p6), %s502_s20, 32  }
  0x5c   : > { %2340 = vsyncadd (%p2962_p6), %s502_s20, 4294967264  ;;  %p562_p13 = scmp.lt.s32.totalorder %s2471_s22, 1  ;;  %vm575_vm0 = vcmask 261120   ;;  %v599_v12 = vld [vmem:[%s2920_s7 + $0x18] sm:$0xff]  ;;  %v598_v13 = vld [vmem:[%s2920_s7 + $0x10] sm:$0xff]  ;;  %vm723_vm1 = vcmask 523264  }
  0x5d   : > { %1990 = vmatprep.subr.mxu0 %v599_v12  ;;  %v597_v14 = vld [vmem:[%s2920_s7 + $0x8] sm:$0xff]  ;;  %v596_v15 = vld [vmem:[%s2920_s7] sm:$0xff]  ;;  %v715_v16 = vld [vmem:[%s2922_s9 + $0x38] sm:$0xff]  ;;  %s2366_s17 = smov 64   ;;  %vm2368_vm3 = vmmov 0   ;;  %s2963_s30 = sld [smem:[#allocation18_spill]] }
  0x5e   : > { %s563_s26 = scalar_select %p562_p13, %s2471_s22, 1  ;;  %1991 = vmatpush3.msra.mxu0 %v599_v12  ;;  %v714_v17 = vld [vmem:[%s2922_s9 + $0x30] sm:$0xff]  ;;  %2004 = vmatprep.subr.mxu1 %v715_v16  ;;  %v713_v18 = vld [vmem:[%s2922_s9 + $0x28] sm:$0xff]  ;;  %v712_v19 = vld [vmem:[%s2922_s9 + $0x20] sm:$0xff]  ;;  %vm1655_vm4 = vcmask 1041409  }
  0x5f   : > { %1992 = vmatprep.subr.mxu0 %v598_v13  ;;  %2005 = vmatpush3.msra.mxu1 %v715_v16  ;;  %v711_v32 = vld [vmem:[%s2922_s9 + $0x18] sm:$0xff]  ;;  %v710_v33 = vld [vmem:[%s2922_s9 + $0x10] sm:$0xff]  ;;  %v709_v34 = vld [vmem:[%s2922_s9 + $0x8] sm:$0xff]  ;;  %s1904_s20 = sshll.u32 %s2471_s22, 5  ;;  %s1741_s29 = scalar_lea.sflag [#allocation4], %s2596_s24 }
  0x60   : > { %s1907_s28 = sshll.u32 %s563_s26, 5  ;;  %1993 = vmatpush3.msra.mxu0 %v598_v13  ;;  %2006 = vmatprep.subr.mxu1 %v714_v17  ;;  %v708_v35 = vld [vmem:[%s2922_s9] sm:$0xff]  ;;  %v828_v36 = vld [vmem:[%s2924_s11 + $0x18] sm:$0xff]  ;;  %v827_v50 = vld [vmem:[%s2924_s11 + $0x10] sm:$0xff]  ;;  %s2365_s26 = smov 96  }
  0x61   : > { %s566_s23 = scalar_lea.vmem %s2913_s0, %s1907_s28  ;;  %1994 = vmatprep.subr.mxu0 %v597_v14  ;;  %2007 = vmatpush3.msra.mxu1 %v714_v17  ;;  %v1872_v37 = vld [vmem:[%s2921_s8] ss:$0 sm:$0xff]  ;;  %v826_v51 = vld [vmem:[%s2924_s11 + $0x8] sm:$0xff]  ;;  %v936_v53 = vld [vmem:[%s2918_s5 + $0x18] sm:$0xff]  ;;  %s2369_s18 = smov [#allocation7]  }
  0x62   : > { %v567_v0 = vld [vmem:[%s566_s23] sm:$0xff]  ;;  %v569_v1 = vld [vmem:[%s566_s23 + $0x10] sm:$0xff]  ;;  %v568_v2 = vld [vmem:[%s566_s23 + $0x8] sm:$0xff]  ;;  %1995 = vmatpush3.msra.mxu0 %v597_v14  ;;  %2008 = vmatprep.subr.mxu1 %v713_v18  ;;  %s2295_s1 = sshll.u32 %s2369_s18, 4  ;;  %s2296_s1 = int_to_ptr.vmem [resolvable:$false] %s2295_s1 }
  0x63   : > { %v571_v3 = vmul.f32 %v567_v0, %v567_v0  ;;  %v573_v4 = vmul.f32 %v569_v1, %v569_v1  ;;  %v572_v5 = vmul.f32 %v568_v2, %v568_v2  ;;  %v570_v6 = vld [vmem:[%s566_s23 + $0x18] sm:$0xff]  ;;  %1996 = vmatprep.subr.mxu0 %v596_v15  ;;  %2009 = vmatpush3.msra.mxu1 %v713_v18  ;;  %v825_v52 = vld [vmem:[%s2924_s11] sm:$0xff]  ;;  %v2363_v18 = vmov -1e+30   ;;  %s2965_s23 = sld [smem:[#allocation19_spill]]  ;;  %s2297_s22 = scalar_lea.vmem %s2296_s1, 64 }
  0x64   : > { %v574_v7 = vmul.f32 %v570_v6, %v570_v6  ;;  %1997 = vmatpush3.msra.mxu0 %v596_v15  ;;  %2010 = vmatprep.subr.mxu1 %v712_v19  ;;  %v1877_v54 = vld [vmem:[%s2923_s10] ss:$0 sm:$0xff]  ;;  %v1038_v15 = vlaneseq }
  0x65   : > { %v576_v8 = vsel %vm575_vm0, %v571_v3, 0.0  ;;  %v582_v9 = vsel %vm575_vm0, %v573_v4, 0.0  ;;  %v579_v10 = vsel %vm575_vm0, %v572_v5, 0.0  ;;  %2011 = vmatpush3.msra.mxu1 %v712_v19  ;;  %2026 = vmatprep.subr.mxu0 %v828_v36  ;;  %v934_v4 = vld [vmem:[%s2918_s5 + $0x8] sm:$0xff]  ;;  %v933_v5 = vld [vmem:[%s2918_s5] sm:$0xff] }
  0x66   : > { %577 = vadd.xlane.f32.xlu0 %v576_v8  ;;  %583 = vadd.xlane.f32.xlu1 %v582_v9  ;;  %v585_v11 = vsel %vm575_vm0, %v574_v7, 0.0  ;;  %v1882_v7 = vld [vmem:[%s2925_s12] ss:$0 sm:$0xff]  ;;  %v1039_v16 = vand.u32 127, %v1038_v15 }
  0x67   : > { %2012 = vmatprep.subr.mxu1 %v711_v32 }
  0x68   : > { %2013 = vmatpush3.msra.mxu1 %v711_v32  ;;  %vm1040_vm2 = vcmp.lt.s32.totalorder %v1039_v16, 8  ;;  %v1096_v32 = vld [vmem:[%s2919_s6 + $0x70] sm:$0xff] }
  0x69   : > { %2014 = vmatprep.subr.mxu1 %v710_v33  ;;  %v1041_v19 = vsel %vm1040_vm2, 0.0, %v2363_v18 }
  0x6a   : > { %580 = vadd.xlane.f32.xlu0 %v579_v10  ;;  %586 = vadd.xlane.f32.xlu1 %v585_v11 }
  0x6b   : > { %2015 = vmatpush3.msra.mxu1 %v710_v33  ;;  %v1095_v33 = vld [vmem:[%s2919_s6 + $0x68] sm:$0xff] }
  0x6c   : > { %2016 = vmatprep.subr.mxu1 %v709_v34 }
  0x6d   : > { %2017 = vmatpush3.msra.mxu1 %v709_v34  ;;  %v1094_v34 = vld [vmem:[%s2919_s6 + $0x60] sm:$0xff] }
  0x6e   : > { %2018 = vmatprep.subr.mxu1 %v708_v35 }
  0x6f   : > { %2019 = vmatpush3.msra.mxu1 %v708_v35  ;;  %v1093_v35 = vld [vmem:[%s2919_s6 + $0x58] sm:$0xff] }
  0xef   : > { %v578_v20 = vpop.xlane.xlu0 %577  ;;  %v584_v21 = vpop.xlane.xlu1 %583 }
  0xf0   : > { %2199 = vrsqrt.f32 %v578_v20 }
  0xf1   : > { %2201 = vrsqrt.f32 %v584_v21 }
  0xf3   : > { %v581_v22 = vpop.xlane.xlu0 %580  ;;  %v587_v23 = vpop.xlane.xlu1 %586 }
  0xf4   : > { %2203 = vrsqrt.f32 %v581_v22 }
  0xf5   : > { %2205 = vrsqrt.f32 %v587_v23 }
  0xfd   : > { %v2200_v24 = vpop.eup %2199 }
  0xfe   : > { %v2202_v25 = vpop.eup %2201  ;;  %v592_v26 = vmul.f32 %v2200_v24, %v567_v0 }
  0xff   : > { %v594_v28 = vmul.f32 %v2202_v25, %v569_v1  ;;  %v935_v1 = vld [vmem:[%s2918_s5 + $0x10] sm:$0xff] }
 0x100   : > { %1998 = vmatprep.mubr.msk.f32.mxu0 %vm575_vm0, %v592_v26 }
 0x101   : > { %v2204_v27 = vpop.eup %2203 }
 0x102   : > { %v2206_v29 = vpop.eup %2205  ;;  %v593_v30 = vmul.f32 %v2204_v27, %v568_v2 }
 0x103   : > { %v595_v31 = vmul.f32 %v2206_v29, %v570_v6 }
 0x104   : > { %1999 = vmatmul.mubr.msk.f32.vlgmr.msra.gmra.mxu0 %vm575_vm0, %v593_v30 }
 0x105   : > { %2001 = vmatprep.mubr.msk.f32.mxu0 %vm575_vm0, %v594_v28  ;;  %2027 = vmatpush3.msra.mxu0 %v828_v36  ;;  %v1092_v36 = vld [vmem:[%s2919_s6 + $0x50] sm:$0xff] }
 0x106   : > { %2028 = vmatprep.subr.mxu0 %v827_v50 }
 0x107   : > { %2029 = vmatpush3.msra.mxu0 %v827_v50 }
 0x108   : > { %2002 = vmatmul.mubr.msk.f32.gmra.mxu0 %vm575_vm0, %v595_v31  ;;  %2030 = vmatprep.subr.mxu0 %v826_v51  ;;  %v1097_v31 = vld [vmem:[%s2919_s6 + $0x78] sm:$0xff] }
 0x109   : > { %2031 = vmatpush3.msra.mxu0 %v826_v51  ;;  %2054 = vmatprep.subr.mxu1 %v1097_v31 }
 0x10a   : > { %2032 = vmatprep.subr.mxu0 %v825_v52 }
 0x10b   : > { %2033 = vmatpush3.msra.mxu0 %v825_v52 }
 0x10c   : > { %2040 = vmatprep.subr.mxu0 %v936_v53 }
 0x1c4   : > { %v2000_v38 = vpop.f32.mrf.mxu0 }
 0x1c5   : > { %v691_v39 = vadd.f32 %v2000_v38, %v1872_v37 }
 0x1c6   : > { %v685_v40 = vpop.f32.mrf.mxu0 }
 0x1c7   : > { %v686_v41 = vadd.f32 %v1872_v37, %v685_v40  ;;  %v705_v44 = vmax.f32 %v691_v39, 0.0 }
 0x1c8   : > { %v2003_v42 = vpop.f32.mrf.mxu0 }
 0x1c9   : > { %v704_v43 = vmax.f32 %v686_v41, 0.0  ;;  %v701_v45 = vadd.f32 %v2003_v42, %v1872_v37 }
 0x1ca   : > { %v695_v46 = vpop.f32.mrf.mxu0 }
 0x1cb   : > { %v696_v47 = vadd.f32 %v1872_v37, %v695_v46  ;;  %2020 = vmatprep.mubr.msk.f32.mxu1 %vm723_vm1, %v704_v43  ;;  %v707_v49 = vmax.f32 %v701_v45, 0.0  ;;  %v1091_v37 = vld [vmem:[%s2919_s6 + $0x48] sm:$0xff] }
 0x1cc   : > { %2021 = vmatmul.mubr.msk.f32.vlgmr.msra.gmra.mxu1 %vm723_vm1, %v705_v44 }
 0x1cd   : > { %v706_v48 = vmax.f32 %v696_v47, 0.0  ;;  %2055 = vmatpush3.msra.mxu1 %v1097_v31  ;;  %v1184_v31 = vld [vmem:[%s2926_s13 + $0x8] sm:$0xff] }
 0x1ce   : > { %2056 = vmatprep.subr.mxu1 %v1096_v32 }
 0x1cf   : > { %2023 = vmatprep.mubr.msk.f32.mxu1 %vm723_vm1, %v706_v48  ;;  %2057 = vmatpush3.msra.mxu1 %v1096_v32 }
 0x1d0   : > { %2024 = vmatmul.mubr.msk.f32.gmra.mxu1 %vm723_vm1, %v707_v49  ;;  %2058 = vmatprep.subr.mxu1 %v1095_v33 }
 0x1d1   : > { %2059 = vmatpush3.msra.mxu1 %v1095_v33 }
 0x1d2   : > { %2060 = vmatprep.subr.mxu1 %v1094_v34 }
 0x1d3   : > { %2061 = vmatpush3.msra.mxu1 %v1094_v34 }
 0x1d4   : > { %2062 = vmatprep.subr.mxu1 %v1093_v35 }
 0x1d5   : > { %2063 = vmatpush3.msra.mxu1 %v1093_v35 }
 0x1d6   : > { %2064 = vmatprep.subr.mxu1 %v1092_v36 }
 0x1d7   : > { %2065 = vmatpush3.msra.mxu1 %v1092_v36 }
 0x1d8   : > { %2066 = vmatprep.subr.mxu1 %v1091_v37 }
 0x1d9   : > { %2067 = vmatpush3.msra.mxu1 %v1091_v37 }
 0x28c   : > { %v2022_v55 = vpop.f32.mrf.mxu1 }
 0x28d   : > { %v808_v56 = vadd.f32 %v2022_v55, %v1877_v54  ;;  %v2364_v55 = vmov 1966171168  }
 0x28e   : > { %v802_v57 = vpop.f32.mrf.mxu1 }
 0x28f   : > { %v803_v58 = vadd.f32 %v1877_v54, %v802_v57  ;;  %v822_v61 = vmax.f32 %v808_v56, 0.0  ;;  %v1498_v56 = vunpack.c.l.s4 %v2364_v55  ;;  %v1089_v57 = vld [vmem:[%s2919_s6 + $0x38] sm:$0xff]  ;;  %v1578_v55 = vld [vmem:[%s2916_s3 + $0x10] sm:$0xff] }
 0x290   : > { %v2025_v59 = vpop.f32.mrf.mxu1 }
 0x291   : > { %v821_v60 = vmax.f32 %v803_v58, 0.0  ;;  %v818_v62 = vadd.f32 %v2025_v59, %v1877_v54  ;;  %v1088_v58 = vld [vmem:[%s2919_s6 + $0x30] sm:$0xff]  ;;  %v1499_v59 = vunpack.c.0.s8 %v1498_v56  ;;  %v1577_v56 = vld [vmem:[%s2916_s3 + $0x8] sm:$0xff] }
 0x292   : > { %v812_v63 = vpop.f32.mrf.mxu1 }
 0x293   : > { %v813_v0 = vadd.f32 %v1877_v54, %v812_v63  ;;  %2034 = vmatprep.mubr.msk.f32.mxu0 %vm575_vm0, %v821_v60  ;;  %v824_v3 = vmax.f32 %v818_v62, 0.0  ;;  %v1090_v54 = vld [vmem:[%s2919_s6 + $0x40] sm:$0xff]  ;;  %v1501_v60 = vshrl.u32 %v1038_v15, 7  ;;  %v1085_v63 = vld [vmem:[%s2919_s6 + $0x18] sm:$0xff] }
 0x294   : > { %2035 = vmatmul.mubr.msk.f32.vlgmr.msra.gmra.mxu0 %vm575_vm0, %v822_v61  ;;  %2068 = vmatprep.subr.mxu1 %v1090_v54  ;;  %v1087_v61 = vld [vmem:[%s2919_s6 + $0x28] sm:$0xff]  ;;  %v1086_v62 = vld [vmem:[%s2919_s6 + $0x20] sm:$0xff] }
 0x295   : > { %v823_v2 = vmax.f32 %v813_v0, 0.0  ;;  %2041 = vmatpush3.msra.mxu0 %v936_v53  ;;  %2069 = vmatpush3.msra.mxu1 %v1090_v54  ;;  %v1900_v0 = vld.sshfl [vmem:[%s505_s16] sm:$0x11 pattern:$0x75316420]  ;;  %v2367_v54 = vmov 0.0   ;;  %s1752_s16 = scalar_lea.hbm %s2965_s23, %s1904_s20 }
 0x296   : > { %2042 = vmatprep.subr.mxu0 %v935_v1  ;;  %2070 = vmatprep.subr.mxu1 %v1089_v57 }
 0x297   : > { %2037 = vmatprep.mubr.msk.f32.mxu0 %vm575_vm0, %v823_v2  ;;  %2043 = vmatpush3.msra.mxu0 %v935_v1  ;;  %v1502_v1 = vsub.s32 %v1499_v59, %v1501_v60  ;;  %v1496_v2 = vcombine.high %v1900_v0, %v1900_v0  ;;  %v1891_v59 = vld [vmem:[%s2963_s30] ss:$0 sm:$0xff] }
 0x298   : > { %2038 = vmatmul.mubr.msk.f32.gmra.mxu0 %vm575_vm0, %v824_v3  ;;  %2044 = vmatprep.subr.mxu0 %v934_v4  ;;  %v1084_v3 = vld [vmem:[%s2919_s6 + $0x10] sm:$0xff] }
 0x299   : > { %2045 = vmatpush3.msra.mxu0 %v934_v4  ;;  %2071 = vmatpush3.msra.mxu1 %v1089_v57  ;;  %v1503_v4 = vrot.slane %v1900_v0, %v1502_v1  ;;  %v1576_v57 = vld [vmem:[%s2916_s3] sm:$0xff] }
 0x29a   : > { %2046 = vmatprep.subr.mxu0 %v933_v5  ;;  %2072 = vmatprep.subr.mxu1 %v1088_v58 }
 0x29b   : > { %2047 = vmatpush3.msra.mxu0 %v933_v5  ;;  %2073 = vmatpush3.msra.mxu1 %v1088_v58  ;;  %v1513_v5 = vsub.s32 0, %v1501_v60  ;;  %v1575_v58 = vld [vmem:[%s496_s14] sm:$0x3]  ;;  %s2964_s14 = sld [smem:[#allocation15_spill]] }
 0x29c   : > { %2074 = vmatprep.subr.mxu1 %v1087_v61 }
 0x29d   : > { %2075 = vmatpush3.msra.mxu1 %v1087_v61 }
 0x29e   : > { %2076 = vmatprep.subr.mxu1 %v1086_v62 }
 0x29f   : > { %2077 = vmatpush3.msra.mxu1 %v1086_v62 }
 0x2a0   : > { %2078 = vmatprep.subr.mxu1 %v1085_v63 }
 0x2a1   : > { %2079 = vmatpush3.msra.mxu1 %v1085_v63  ;;  %p2966_p7 = scmp.ne.s32.totalorder %s2964_s14, 0 }
 0x2a2   : > { %2080 = vmatprep.subr.mxu1 %v1084_v3 }
 0x2a3   : > { %2081 = vmatpush3.msra.mxu1 %v1084_v3 }
 0x354   : > { %v2036_v6 = vpop.f32.mrf.mxu0 }
 0x355   : > { %v2701_v10 = vadd.f32 %v2036_v6, %v1882_v7  ;;  %v1083_v6 = vld [vmem:[%s2919_s6 + $0x8] sm:$0xff] }
 0x356   : > { %v914_v8 = vpop.f32.mrf.mxu0  ;;  %2082 = vmatprep.subr.mxu1 %v1083_v6 }
 0x357   : > { %v2699_v9 = vadd.f32 %v1882_v7, %v914_v8  ;;  %2083 = vmatpush3.msra.mxu1 %v1083_v6  ;;  %v1082_v8 = vld [vmem:[%s2919_s6] sm:$0xff] }
 0x358   : > { %v2039_v11 = vpop.f32.mrf.mxu0  ;;  %2084 = vmatprep.subr.mxu1 %v1082_v8 }
 0x359   : > { %2048 = vmatprep.mubr.msk.f32.mxu0 %vm575_vm0, %v2699_v9  ;;  %v2709_v14 = vadd.f32 %v2039_v11, %v1882_v7  ;;  %v1514_v11 = vrot.slane %v1503_v4, %v1513_v5  ;;  %2085 = vmatpush3.msra.mxu1 %v1082_v8 }
 0x35a   : > { %v924_v12 = vpop.f32.mrf.mxu0  ;;  %2049 = vmatmul.mubr.msk.f32.vlgmr.msra.gmra.mxu0 %vm575_vm0, %v2701_v10 }
 0x35b   : > { %v2707_v13 = vadd.f32 %v1882_v7, %v924_v12  ;;  %v1510_v7 = vrot.slane %v1496_v2, %v1502_v1 }
 0x35d   : > { %2051 = vmatprep.mubr.msk.f32.mxu0 %vm575_vm0, %v2707_v13  ;;  %v1518_v12 = vrot.slane %v1510_v7, %v1513_v5 }
 0x35e   : > { %2052 = vmatmul.mubr.msk.f32.gmra.mxu0 %vm575_vm0, %v2709_v14 }
 0x41a   : > { %v2050_v17 = vpop.f32.mrf.mxu0 }
 0x41b   : > { %v1035_v20 = vmul.f32 0.17677669, %v2050_v17 }
 0x41c   : > { %v1015_v21 = vpop.f32.mrf.mxu0 }
 0x41d   : > { %v1034_v22 = vmul.f32 0.17677669, %v1015_v21  ;;  %v1043_v23 = vadd.f32 %v1041_v19, %v1035_v20 }
 0x41e   : > { %v2053_v24 = vpop.f32.mrf.mxu0 }
 0x41f   : > { %v1037_v25 = vmul.f32 0.17677669, %v2053_v24  ;;  %1048 = vmax.xlane.f32.xlu1 %v1043_v23  ;;  %v1042_v26 = vadd.f32 %v1041_v19, %v1034_v22 }
 0x420   : > { %v1025_v27 = vpop.f32.mrf.mxu0 }
 0x421   : > { %v1036_v28 = vmul.f32 0.17677669, %v1025_v27  ;;  %1046 = vmax.xlane.f32.xlu0 %v1042_v26  ;;  %v1045_v29 = vadd.f32 %v1041_v19, %v1037_v25 }
 0x423   : > { %1052 = vmax.xlane.f32.xlu1 %v1045_v29  ;;  %v1044_v30 = vadd.f32 %v1041_v19, %v1036_v28  ;;  %v1186_v28 = vld [vmem:[%s2926_s13 + $0x18] sm:$0xff] }
 0x424   : > { %2092 = vmatprep.subr.mxu0 %v1186_v28 }
 0x425   : > { %1050 = vmax.xlane.f32.xlu0 %v1044_v30  ;;  %2093 = vmatpush3.msra.mxu0 %v1186_v28 }
 0x4a8   : > { %v1049_v38 = vpop.xlane.xlu1 %1048 }
 0x4a9   : > { %v1055_v39 = vsub.f32 %v1043_v23, %v1049_v38  ;;  %v1183_v38 = vld [vmem:[%s2926_s13] sm:$0xff] }
 0x4aa   : > { %v1047_v40 = vpop.xlane.xlu0 %1046 }
 0x4ab   : > { %v1060_v41 = vmul.f32 1.442695, %v1055_v39  ;;  %v1054_v42 = vsub.f32 %v1042_v26, %v1047_v40 }
 0x4ac   : > { %v1053_v43 = vpop.xlane.xlu1 %1052 }
 0x4ad   : > { %2207 = vpow2.f32 %v1060_v41  ;;  %v1058_v44 = vmul.f32 1.442695, %v1054_v42  ;;  %v1057_v45 = vsub.f32 %v1045_v29, %v1053_v43 }
 0x4ae   : > { %v1051_v46 = vpop.xlane.xlu0 %1050 }
 0x4af   : > { %2209 = vpow2.f32 %v1058_v44  ;;  %v1064_v47 = vmul.f32 1.442695, %v1057_v45  ;;  %v1056_v48 = vsub.f32 %v1044_v30, %v1051_v46  ;;  %v1185_v30 = vld [vmem:[%s2926_s13 + $0x10] sm:$0xff] }
 0x4b0   : > { %2094 = vmatprep.subr.mxu0 %v1185_v30 }
 0x4b1   : > { %2211 = vpow2.f32 %v1064_v47  ;;  %v1062_v49 = vmul.f32 1.442695, %v1056_v48  ;;  %2095 = vmatpush3.msra.mxu0 %v1185_v30  ;;  %v1334_v48 = vld [vmem:[%s2917_s4 + $0x10] sm:$0xff] }
 0x4b2   : > { %2096 = vmatprep.subr.mxu0 %v1184_v31 }
 0x4b3   : > { %2213 = vpow2.f32 %v1062_v49  ;;  %2097 = vmatpush3.msra.mxu0 %v1184_v31 }
 0x4b4   : > { %2098 = vmatprep.subr.mxu0 %v1183_v38 }
 0x4b5   : > { %2099 = vmatpush3.msra.mxu0 %v1183_v38 }
 0x4ba   : > { %v2737_v50 = vpop.eup %2207 }
 0x4bb   : > { %1068 = vadd.xlane.f32.xlu1 %v2737_v50 }
 0x4bc   : > { %v2740_v51 = vpop.eup %2209 }
 0x4bd   : > { %1066 = vadd.xlane.f32.xlu0 %v2740_v51 }
 0x4be   : > { %v2743_v52 = vpop.eup %2211 }
 0x4bf   : > { %1072 = vadd.xlane.f32.xlu1 %v2743_v52 }
 0x4c0   : > { %v2746_v53 = vpop.eup %2213 }
 0x4c1   : > { %1070 = vadd.xlane.f32.xlu0 %v2746_v53 }
 0x4d0   : > { %1338 = vrot.lane.b32.xlu1 %v2701_v10, %s2365_s26 }
 0x4d4   : > { %1340 = vrot.lane.b32.xlu1 %v2707_v13, %s2365_s26 }
 0x4d7   : > { %1336 = vrot.lane.b32.xlu0 %v2699_v9, %s2365_s26 }
 0x4d8   : > { %1342 = vrot.lane.b32.xlu1 %v2709_v14, %s2365_s26  ;;  %s561_s26 = scalar_lea.vmem [#allocation7], %s2599_s27 }
 0x4d9   : > { %s1754_s28 = sshll.u32 %s561_s26, 4  ;;  %s1755_s28 = int_to_ptr.vmem [resolvable:$true] %s1754_s28 }
 0x4da   : > { %p2298_p2 = scmp.lt.s32.totalorder %s1755_s28, %s2296_s1 }
 0x4db   : > { %1519 = vrot.lane.b32.xlu0 %v1514_v11, %s2366_s17 }
 0x4dc   : > { %1521 = vrot.lane.b32.xlu1 %v1518_v12, %s2366_s17 }
 0x544   : > { %v1069_v15 = vpop.xlane.xlu1 %1068 }
 0x545   : > { %2215 = vrcp.f32 %v1069_v15 }
 0x546   : > { %v1067_v16 = vpop.xlane.xlu0 %1066 }
 0x547   : > { %2217 = vrcp.f32 %v1067_v16 }
 0x548   : > { %v1073_v17 = vpop.xlane.xlu1 %1072 }
 0x549   : > { %2219 = vrcp.f32 %v1073_v17 }
 0x54a   : > { %v1071_v18 = vpop.xlane.xlu0 %1070 }
 0x54b   : > { %2221 = vrcp.f32 %v1071_v18 }
 0x54c   : > { %v2785_v19 = vpop.permute.xlu1 %1338 }
 0x54e   : > { %v2787_v20 = vpop.permute.xlu0 %1336 }
 0x550   : > { %v2789_v21 = vpop.permute.xlu1 %1340 }
 0x552   : > { %v1520_v22 = vpop.permute.xlu0 %1519  ;;  %v2216_v23 = vpop.eup %2215 }
 0x553   : > { %v1525_v24 = vmul.f32 %v1520_v22, %v2699_v9  ;;  %v1526_v25 = vmul.f32 %v1520_v22, %v2701_v10  ;;  %v1079_v9 = vmul.f32 %v2216_v23, %v2737_v50  ;;  %v1333_v50 = vld [vmem:[%s2917_s4 + $0x8] sm:$0xff] }
 0x554   : > { %v2218_v26 = vpop.eup %2217  ;;  %v2793_v27 = vpop.permute.xlu1 %1342 }
 0x555   : > { %1535 = vrot.lane.b32.xlu1 %v1526_v25, %s2366_s17  ;;  %1533 = vrot.lane.b32.xlu0 %v1525_v24, %s2366_s17  ;;  %v1078_v29 = vmul.f32 %v2218_v26, %v2740_v51 }
 0x556   : > { %v2220_v10 = vpop.eup %2219 }
 0x557   : > { %2086 = vmatprep.mubr.f32.mxu1 %v1078_v29  ;;  %v1081_v37 = vmul.f32 %v2220_v10, %v2743_v52  ;;  %v1332_v52 = vld [vmem:[%s2917_s4] sm:$0xff] }
 0x558   : > { %v2222_v32 = vpop.eup %2221  ;;  %v1522_v33 = vpop.permute.xlu1 %1521  ;;  %2087 = vmatmul.mubr.f32.vlgmr.msra.gmra.mxu1 %v1079_v9 }
 0x559   : > { %v1527_v34 = vmul.f32 %v1522_v33, %v2707_v13  ;;  %v1528_v35 = vmul.f32 %v1522_v33, %v2709_v14  ;;  %v1080_v36 = vmul.f32 %v2222_v32, %v2746_v53  ;;  %v1335_v13 = vld [vmem:[%s2917_s4 + $0x18] sm:$0xff] }
 0x55a   : > { %2106 = vmatprep.subr.mxu0 %v1335_v13  ;;  %v1579_v53 = vld [vmem:[%s2916_s3 + $0x18] sm:$0xff] }
 0x55b   : > { %2089 = vmatprep.mubr.f32.mxu1 %v1080_v36  ;;  %1539 = vrot.lane.b32.xlu1 %v1528_v35, %s2366_s17 }
 0x55c   : > { %1537 = vrot.lane.b32.xlu0 %v1527_v34, %s2366_s17  ;;  %2090 = vmatmul.mubr.f32.gmra.mxu1 %v1081_v37  ;;  %s2291_s17 = scalar_lea.vmem %s1755_s28, 32 }
 0x55d   : > { %p2292_p3 = scmp.ne.s32.totalorder %s1755_s28, %s2291_s17  ;;  %p2299_p4 = scmp.lt.s32.totalorder %s2297_s22, %s2291_s17 }
 0x55f   : > { %p2293_p8 = pnand %p2292_p3, %p2966_p7  ;;  %p2300_p5 = por %p2299_p4, %p2298_p2 }
 0x561   : > { %p2294_p10 = pneg %p2293_p8 }
 0x563   : > { %p2301_p9 = pnand %p2300_p5, %p2294_p10 }
 0x5c7   : > { %v1536_v14 = vpop.permute.xlu1 %1535  ;;  %v1534_v39 = vpop.permute.xlu0 %1533 }
 0x5c8   : > { %v1548_v40 = vsel %vm575_vm0, %v1536_v14, 0.0  ;;  %v1545_v41 = vsel %vm575_vm0, %v1534_v39, 0.0 }
 0x5c9   : > { %1549 = vadd.xlane.f32.xlu1 %v1548_v40  ;;  %1546 = vadd.xlane.f32.xlu0 %v1545_v41 }
 0x5cd   : > { %v1540_v44 = vpop.permute.xlu1 %1539 }
 0x5ce   : > { %v1538_v42 = vpop.permute.xlu0 %1537  ;;  %v1554_v45 = vsel %vm575_vm0, %v1540_v44, 0.0 }
 0x5cf   : > { %v1551_v43 = vsel %vm575_vm0, %v1538_v42, 0.0 }
 0x5d0   : > { %1552 = vadd.xlane.f32.xlu0 %v1551_v43 }
 0x5d4   : > { %1555 = vadd.xlane.f32.xlu0 %v1554_v45 }
 0x618   : > { %v2088_v46 = vpop.f32.mrf.mxu1 }
 0x61a   : > { %v1164_v47 = vpop.f32.mrf.mxu1 }
 0x61b   : > { %2100 = vmatprep.mubr.msk.f32.mxu0 %vm575_vm0, %v1164_v47 }
 0x61c   : > { %v2091_v49 = vpop.f32.mrf.mxu1  ;;  %2101 = vmatmul.mubr.msk.f32.vlgmr.msra.gmra.mxu0 %vm575_vm0, %v2088_v46 }
 0x61d   : > { %2107 = vmatpush3.msra.mxu0 %v1335_v13 }
 0x61e   : > { %v1174_v51 = vpop.f32.mrf.mxu1  ;;  %2108 = vmatprep.subr.mxu0 %v1334_v48 }
 0x61f   : > { %2103 = vmatprep.mubr.msk.f32.mxu0 %vm575_vm0, %v1174_v51  ;;  %2109 = vmatpush3.msra.mxu0 %v1334_v48 }
 0x620   : > { %2104 = vmatmul.mubr.msk.f32.gmra.mxu0 %vm575_vm0, %v2091_v49  ;;  %2110 = vmatprep.subr.mxu0 %v1333_v50 }
 0x621   : > { %2111 = vmatpush3.msra.mxu0 %v1333_v50  ;;  %2114 = vmatprep.mubr.msk.f32.mxu0 %vm575_vm0, %v2787_v20 }
 0x622   : > { %2112 = vmatprep.subr.mxu0 %v1332_v52 }
 0x623   : > { %2113 = vmatpush3.msra.mxu0 %v1332_v52 }
 0x624   : > { %2115 = vmatmul.mubr.msk.f32.vlgmr.msra.gmra.mxu0 %vm575_vm0, %v2785_v19  ;;  %2120 = vmatprep.subr.mxu0 %v2367_v54 }
 0x625   : > { %2117 = vmatprep.mubr.msk.f32.mxu0 %vm575_vm0, %v2789_v21  ;;  %2121 = vmatpush3.msra.mxu0 %v1579_v53 }
 0x626   : > { %2122 = vmatprep.subr.mxu0 %v2367_v54 }
 0x627   : > { %2123 = vmatpush3.msra.mxu0 %v1578_v55 }
 0x628   : > { %2118 = vmatmul.mubr.msk.f32.gmra.mxu0 %vm575_vm0, %v2793_v27  ;;  %2124 = vmatprep.subr.mxu0 %v2367_v54 }
 0x629   : > { %2125 = vmatpush3.msra.mxu0 %v1577_v56  ;;  %2128 = vmatprep.mubr.msk.f32.mxu0 %vm2368_vm3, %v2367_v54 }
 0x62a   : > { %2126 = vmatprep.subr.mxu0 %v2367_v54 }
 0x62b   : > { %2127 = vmatpush3.msra.mxu0 %v1576_v57 }
 0x62c   : > { %2129 = vmatmul.mubr.msk.f32.vlgmr.msra.gmra.mxu0 %vm575_vm0, %v1575_v58  ;;  %2131 = vmatprep.subr.mxu0 %v2367_v54 }
 0x62d   : > { %2132 = vmatpush3.msra.mxu0 %v1579_v53  ;;  %2139 = vmatprep.mubr.msk.f32.mxu0 %vm2368_vm3, %v2367_v54 }
 0x62e   : > { %2133 = vmatprep.subr.mxu0 %v2367_v54 }
 0x62f   : > { %2134 = vmatpush3.msra.mxu0 %v1578_v55 }
 0x630   : > { %2135 = vmatprep.subr.mxu0 %v2367_v54 }
 0x631   : > { %2136 = vmatpush3.msra.mxu0 %v1577_v56 }
 0x632   : > { %2137 = vmatprep.subr.mxu0 %v2367_v54 }
 0x633   : > { %2138 = vmatpush3.msra.mxu0 %v1576_v57 }
 0x6dc   : > { %v2102_v60 = vpop.f32.mrf.mxu0 }
 0x6dd   : > { %v1278_v61 = vadd.f32 %v2102_v60, %v1891_v59 }
 0x6de   : > { %v1272_v62 = vpop.f32.mrf.mxu0 }
 0x6df   : > { %v1273_v63 = vadd.f32 %v1891_v59, %v1272_v62  ;;  %v1292_v0 = vsel %vm575_vm0, %v1278_v61, 0.0  ;;  %v1313_v2 = vsel %vm575_vm0, %v1278_v61, -inf }
 0x6e0   : > { %v2105_v1 = vpop.f32.mrf.mxu0 }
 0x6e1   : > { %v1291_v3 = vsel %vm575_vm0, %v1273_v63, 0.0  ;;  %v1312_v4 = vsel %vm575_vm0, %v1273_v63, -inf  ;;  %v1288_v5 = vadd.f32 %v2105_v1, %v1891_v59 }
 0x6e2   : > { %v1293_v6 = vadd.f32 %v1292_v0, %v1291_v3  ;;  %v1314_v7 = vmax.f32 %v1312_v4, %v1313_v2  ;;  %v1282_v8 = vpop.f32.mrf.mxu0 }
 0x6e3   : > { %v1283_v11 = vadd.f32 %v1891_v59, %v1282_v8  ;;  %v1301_v17 = vsel %vm575_vm0, %v1288_v5, 0.0  ;;  %v1322_v18 = vsel %vm575_vm0, %v1288_v5, -inf }
 0x6e4   : > { %v1294_v12 = vrot.slane %v1293_v6, 4  ;;  %v1315_v15 = vrot.slane %v1314_v7, 4  ;;  %v2116_v16 = vpop.f32.mrf.mxu0 }
 0x6e5   : > { %v1300_v19 = vsel %vm575_vm0, %v1283_v11, 0.0  ;;  %v1321_v20 = vsel %vm575_vm0, %v1283_v11, -inf  ;;  %v1438_v26 = vmul.f32 0.17677669, %v2116_v16 }
 0x6e6   : > { %v1295_v21 = vadd.f32 %v1294_v12, %v1293_v6  ;;  %v1316_v22 = vmax.f32 %v1314_v7, %v1315_v15  ;;  %v1302_v23 = vadd.f32 %v1301_v17, %v1300_v19  ;;  %v1323_v24 = vmax.f32 %v1321_v20, %v1322_v18  ;;  %v1418_v25 = vpop.f32.mrf.mxu0 }
 0x6e7   : > { %v1437_v27 = vmul.f32 0.17677669, %v1418_v25 }
 0x6e8   : > { %v1296_v28 = vrot.slane %v1295_v21, 2  ;;  %v1317_v29 = vrot.slane %v1316_v22, 2  ;;  %v1303_v30 = vrot.slane %v1302_v23, 4  ;;  %v1324_v9 = vrot.slane %v1323_v24, 4  ;;  %v2119_v10 = vpop.f32.mrf.mxu0 }
 0x6e9   : > { %v1441_v31 = vmax.f32 %v1437_v27, %v1438_v26  ;;  %v1440_v37 = vmul.f32 0.17677669, %v2119_v10 }
 0x6ea   : > { %v1297_v32 = vadd.f32 %v1296_v28, %v1295_v21  ;;  %v1304_v33 = vadd.f32 %v1303_v30, %v1302_v23  ;;  %v1325_v34 = vmax.f32 %v1323_v24, %v1324_v9  ;;  %v1428_v35 = vpop.f32.mrf.mxu0  ;;  %v1318_v14 = vmax.f32 %v1316_v22, %v1317_v29 }
 0x6eb   : > { %v1442_v36 = vrot.slane %v1441_v31, 4  ;;  %v1439_v38 = vmul.f32 0.17677669, %v1428_v35 }
 0x6ec   : > { %v1298_v13 = vrot.slane %v1297_v32, 1  ;;  %v1305_v39 = vrot.slane %v1304_v33, 2  ;;  %v1326_v40 = vrot.slane %v1325_v34, 2  ;;  %v2871_v41 = vpop.f32.mrf.mxu0  ;;  %v1319_v50 = vrot.slane %v1318_v14, 1 }
 0x6ed   : > { %v1443_v42 = vmax.f32 %v1441_v31, %v1442_v36  ;;  %v1448_v43 = vmax.f32 %v1439_v38, %v1440_v37 }
 0x6ee   : > { %v1299_v44 = vadd.f32 %v1298_v13, %v1297_v32  ;;  %v1306_v45 = vadd.f32 %v1305_v39, %v1304_v33  ;;  %v1327_v46 = vmax.f32 %v1325_v34, %v1326_v40  ;;  %v2130_v47 = vpop.f32.mrf.mxu0  ;;  %v1320_v59 = vmax.f32 %v1318_v14, %v1319_v50  ;;  %v1547_v33 = vpop.xlane.xlu0 %1546 }
 0x6ef   : > { %v1444_v48 = vrot.slane %v1443_v42, 2  ;;  %v1449_v49 = vrot.slane %v1448_v43, 4 }
 0x6f0   : > { %v1307_v51 = vrot.slane %v1306_v45, 1  ;;  %v1328_v52 = vrot.slane %v1327_v46, 1  ;;  %v1310_v55 = vmul.f32 0.0625, %v1299_v44 }
 0x6f1   : > { %v1445_v53 = vmax.f32 %v1443_v42, %v1444_v48  ;;  %v1450_v54 = vmax.f32 %v1448_v43, %v1449_v49 }
 0x6f2   : > { %v1308_v56 = vadd.f32 %v1307_v51, %v1306_v45  ;;  %v1329_v61 = vmax.f32 %v1327_v46, %v1328_v52  ;;  %v1330_v0 = vadd.f32 %v1320_v59, %v1310_v55  ;;  %v1553_v35 = vpop.xlane.xlu0 %1552 }
 0x6f3   : > { %v1446_v57 = vrot.slane %v1445_v53, 1  ;;  %v1451_v58 = vrot.slane %v1450_v54, 2 }
 0x6f4   : > { %v1311_v60 = vmul.f32 0.0625, %v1308_v56 }
 0x6f5   : > { %v1447_v62 = vmax.f32 %v1445_v53, %v1446_v57  ;;  %v1452_v63 = vmax.f32 %v1450_v54, %v1451_v58 }
 0x6f6   : > { %v1331_v1 = vadd.f32 %v1329_v61, %v1311_v60  ;;  %v1556_v44 = vpop.xlane.xlu0 %1555  ;;  %v1729_v60 = vmul.f32 14.285714, %v2871_v41 }
 0x6f7   : > { %v1455_v2 = vsub.f32 %v1437_v27, %v1447_v62  ;;  %v1456_v3 = vsub.f32 %v1438_v26, %v1447_v62  ;;  %v1453_v4 = vrot.slane %v1452_v63, 1 }
 0x6f8   : > { %v1656_v5 = vsel %vm1655_vm4, %v1331_v1, %v1330_v0 }
 0x6f9   : > { %v1459_v6 = vmul.f32 1.442695, %v1455_v2  ;;  %v1461_v7 = vmul.f32 1.442695, %v1456_v3  ;;  %v1454_v8 = vmax.f32 %v1452_v63, %v1453_v4  ;;  %2140 = vmatmul.mubr.msk.f32.vlgmr.msra.gmra.mxu0 %vm575_vm0, %v1656_v5 }
 0x6fb   : > { %2223 = vpow2.f32 %v1459_v6  ;;  %v1457_v11 = vsub.f32 %v1439_v38, %v1454_v8  ;;  %v1458_v12 = vsub.f32 %v1440_v37, %v1454_v8  ;;  %v1550_v38 = vpop.xlane.xlu1 %1549 }
 0x6fc   : > { %2225 = vpow2.f32 %v1461_v7 }
 0x6fd   : > { %v1463_v15 = vmul.f32 1.442695, %v1457_v11  ;;  %v1465_v16 = vmul.f32 1.442695, %v1458_v12 }
 0x6ff   : > { %2227 = vpow2.f32 %v1463_v15 }
 0x700   : > { %2229 = vpow2.f32 %v1465_v16 }
 0x708   : > { %v2224_v17 = vpop.eup %2223 }
 0x709   : > { %v2226_v18 = vpop.eup %2225 }
 0x70a   : > { %v1467_v19 = vadd.f32 %v2226_v18, %v2224_v17 }
 0x70c   : > { %v2228_v20 = vpop.eup %2227  ;;  %v1468_v21 = vrot.slane %v1467_v19, 4 }
 0x70d   : > { %v2230_v22 = vpop.eup %2229 }
 0x70e   : > { %v1469_v23 = vadd.f32 %v1468_v21, %v1467_v19  ;;  %v1474_v24 = vadd.f32 %v2230_v22, %v2228_v20 }
 0x710   : > { %v1470_v25 = vrot.slane %v1469_v23, 2  ;;  %v1475_v26 = vrot.slane %v1474_v24, 4 }
 0x712   : > { %v1471_v27 = vadd.f32 %v1470_v25, %v1469_v23  ;;  %v1476_v28 = vadd.f32 %v1475_v26, %v1474_v24 }
 0x714   : > { %v1472_v29 = vrot.slane %v1471_v27, 1  ;;  %v1477_v30 = vrot.slane %v1476_v28, 2 }
 0x716   : > { %v1473_v9 = vadd.f32 %v1472_v29, %v1471_v27  ;;  %v1478_v10 = vadd.f32 %v1477_v30, %v1476_v28 }
 0x718   : > { %2231 = vrcp.f32 %v1473_v9  ;;  %v1479_v31 = vrot.slane %v1478_v10, 1 }
 0x71a   : > { %v1480_v32 = vadd.f32 %v1479_v31, %v1478_v10 }
 0x71c   : > { %2233 = vrcp.f32 %v1480_v32 }
 0x725   : > { %v2232_v34 = vpop.eup %2231 }
 0x726   : > { %v1483_v36 = vmul.f32 %v2232_v34, %v2224_v17  ;;  %v1484_v37 = vmul.f32 %v2232_v34, %v2226_v18 }
 0x728   : > { %v1557_v13 = vmul.f32 %v1547_v33, %v1483_v36  ;;  %v1558_v14 = vmul.f32 %v1550_v38, %v1484_v37 }
 0x729   : > { %v2234_v39 = vpop.eup %2233 }
 0x72a   : > { %v1485_v40 = vmul.f32 %v2234_v39, %v2228_v20  ;;  %v1486_v42 = vmul.f32 %v2234_v39, %v2230_v22  ;;  %v1561_v43 = vadd.f32 %v1558_v14, %v1557_v13 }
 0x72c   : > { %v1559_v45 = vmul.f32 %v1553_v35, %v1485_v40  ;;  %v1560_v46 = vmul.f32 %v1556_v44, %v1486_v42  ;;  %v1562_v47 = vrot.slane %v1561_v43, 4 }
 0x72e   : > { %v1563_v48 = vadd.f32 %v1562_v47, %v1561_v43  ;;  %v1568_v49 = vadd.f32 %v1560_v46, %v1559_v45 }
 0x730   : > { %v1564_v50 = vrot.slane %v1563_v48, 2  ;;  %v1569_v51 = vrot.slane %v1568_v49, 4 }
 0x732   : > { %v1565_v52 = vadd.f32 %v1564_v50, %v1563_v48  ;;  %v1570_v53 = vadd.f32 %v1569_v51, %v1568_v49 }
 0x734   : > { %v1566_v54 = vrot.slane %v1565_v52, 1  ;;  %v1571_v55 = vrot.slane %v1570_v53, 2 }
 0x736   : > { %v1572_v56 = vadd.f32 %v1571_v55, %v1570_v53  ;;  %v1567_v57 = vadd.f32 %v1566_v54, %v1565_v52 }
 0x738   : > { %v1573_v58 = vrot.slane %v1572_v56, 1  ;;  %v1730_v61 = vmul.f32 7.142857, %v1567_v57 }
 0x73a   : > { %v1574_v59 = vadd.f32 %v1573_v58, %v1572_v56 }
 0x73c   : > { %v1731_v62 = vmul.f32 7.142857, %v1574_v59 }
 0x73e   : > { %v1734_v63 = vsel %vm1655_vm4, %v1731_v62, %v1730_v61 }
 0x73f   : > { %v1736_v0 = vadd.f32 %v1734_v63, %v1729_v60 }
 0x7b9   : > { %v1725_v1 = vpop.f32.mrf.mxu0 }
 0x7ba   : > { %v1737_v2 = vmul.f32 3.5714285, %v1725_v1 }
 0x7bb   : > { %v2141_v3 = vpop.f32.mrf.mxu0 }
 0x7bc   : > { %v1738_v4 = vadd.f32 %v1737_v2, %v1736_v0 }
 0x7be   : > { %1739 = vst [vmem:[%s561_s26] sm:$0x3] %v1738_v4 }
 0x7bf   : > { %2304 = shalt.err (!%p2301_p9)
}
 0x7c0   : > { %s2305_s27 = scalar_lea.hbm %s1752_s16, 32  ;;  %s2309_s20 = scalar_lea.hbm %s2965_s23, 64 }
 0x7c1   : > { %p2306_p0 = scmp.ne.s32.totalorder %s1752_s16, %s2305_s27  ;;  %p2310_p1 = scmp.lt.s32.totalorder %s1752_s16, %s2965_s23 }
 0x7c2   : > { %p2311_p6 = scmp.lt.s32.totalorder %s2309_s20, %s2305_s27 }
 0x7c3   : > { %p2307_p11 = pnand %p2306_p0, %p2966_p7 }
 0x7c4   : > { %p2312_p13 = por %p2311_p6, %p2310_p1 }
 0x7c5   : > { %p2308_p12 = pneg %p2307_p11 }
 0x7c7   : > { %p2313_p3 = pnand %p2312_p13, %p2308_p12 }
 0x7c9   : > { %2316 = shalt.err (!%p2313_p3)
}
 0x7ca   : > { %2146 = dma.vmem_to_hbm [thread:$0]  (%p2966_p7), %s1755_s28, 32, %s1752_s16, %s1741_s29  }
 0x7cb PF: > { %s2967_s25 = sld [smem:[#allocation11_spill]]  ;;  %p2970_p10 = scmp.ge.s32.totalorder %s2359_s21, 2 }
 0x7cc   : > { %s2968_s17 = sld [smem:[#allocation16_spill]] }
 0x7d1   : > { %s1766_s18 = sand.u32 1, %s2967_s25  }
 0x7d2   : > { %p2969_p8 = scmp.ne.s32.totalorder %s2968_s17, 0  ;;  %s1767_s1 = scalar_lea.sflag [#allocation4], %s1766_s18 }
 0x7d4   : > { %p2156_p2 = pnand %p2970_p10, %p2969_p8 }
 0x7d6   : > { %p2157_p4 = pneg %p2156_p2 }
 0x7d8   : > { %2342 = dma.done.wait (%p2157_p4), %s1767_s1, 32  }
 0x7d9   : > { %2344 = vsyncadd (%p2157_p4), %s1767_s1, 4294967264  ;;  %s2971_s21 = sld [smem:[#allocation13_spill]]  ;;  %s2974_s18 = smov %s2351_s19 }
 0x7da   : > { %s2972_s22 = sld [smem:[#allocation12_spill]] }
 0x7db   : > { %s2973_s20 = sld [smem:[#allocation14_spill]] }
 0x7df   : > { %p31_p5 = scmp.ge.s32.totalorder %s2971_s21, 4  }
 0x7e0   : > { %s2975_s19 = smov %s2972_s22 }
 0x7e1   :  { %33 = sbr.rel (!%p31_p5) target bundleno = 11 (0xb), region = 141 }
 0x7e6   :  { %1772 = vsyncpa [#allocation3], 1 }
 0x7e7   :  { %1774 = vsyncpa [#allocation3 + $0x1], 1 }
 0x7e8   :  { %1775 = vsyncpa [#allocation6], 1 }
 0x7e9   :  { %1777 = vsyncpa [#allocation6 + $0x1], 1 }
 0x7ea   :  { %1778 = vsyncpa [#allocation4], 1 }
 0x7eb   :  { %1780 = vsyncpa [#allocation4 + $0x1], 1 }

// kernel: tpu_custom_call.1
= control target key start
LH: loop header
LB: loop body
LE: loop exit
PB: predicated region body
PF: predicated region fallthrough
CT: control target
= control target key end

     0   :  { %s2913_s0 = inlined_call_operand.vmem [shape: f32[2,32,32], index: 0, kind: input, shape index: {}]   ;;  %s2914_s1 = inlined_call_operand.hbm [shape: f32[2,2,32], index: 1, kind: input, shape index: {}]   ;;  %s2915_s2 = inlined_call_operand.hbm [shape: f32[2,2,32], index: 2, kind: input, shape index: {}]   ;;  %s2916_s3 = inlined_call_operand.vmem [shape: f32[32,128], index: 3, kind: input, shape index: {}]   ;;  %s2917_s4 = inlined_call_operand.vmem [shape: f32[32,128], index: 4, kind: input, shape index: {}]   ;;  %s2918_s5 = inlined_call_operand.vmem [shape: f32[32,128], index: 5, kind: input, shape index: {}]   ;;  %s2919_s6 = inlined_call_operand.vmem [shape: f32[128,32], index: 6, kind: input, shape index: {}]   ;;  %s2920_s7 = inlined_call_operand.vmem [shape: f32[32,64], index: 7, kind: input, shape index: {}]   ;;  %s2921_s8 = inlined_call_operand.vmem [shape: f32[1,64], index: 8, kind: input, shape index: {}]   ;;  %s2922_s9 = inlined_call_operand.vmem [shape: f32[64,32], index: 9, kind: input, shape index: {}]   ;;  %s2923_s10 = inlined_call_operand.vmem [shape: f32[1,32], index: 10, kind: input, shape index: {}]   ;;  %s2924_s11 = inlined_call_operand.vmem [shape: f32[32,96], index: 11, kind: input, shape index: {}]   ;;  %s2925_s12 = inlined_call_operand.vmem [shape: f32[1,96], index: 12, kind: input, shape index: {}]   ;;  %s2926_s13 = inlined_call_operand.vmem [shape: f32[32,32], index: 13, kind: input, shape index: {}]   ;;  %s2927_s14 = inlined_call_operand.vmem [shape: f32[1,32], index: 14, kind: input, shape index: {}]   ;;  %s2928_s15 = inlined_call_operand.hbm [shape: f32[2,2,128], index: 15, kind: output, shape index: {}]  }
   0x1   :  { %2941 = sst [smem:[#allocation17_spill]] %s2914_s1 }
   0x2   :  { %2942 = sst [smem:[#allocation18_spill]] %s2927_s14 }
   0x3   :  { %2943 = sst [smem:[#allocation19_spill]] %s2928_s15 }
   0x4   :  { %20 = vsyncpa [#allocation3], 0 }
   0x5   :  { %22 = vsyncpa [#allocation3 + $0x1], 0 }
   0x6   :  { %23 = vsyncpa [#allocation6], 0 }
   0x7   :  { %25 = vsyncpa [#allocation6 + $0x1], 0 }
   0x8   :  { %26 = vsyncpa [#allocation4], 0 }
   0x9   :  { %28 = vsyncpa [#allocation4 + $0x1], 0  ;;  %s2450_s18 = smov 0   ;;  %s2452_s19 = smov 0  }
   0xa   :  { %s2454_s20 = smov 0   ;;  %s2456_s21 = smov 0  }
   0xb LB: > { %2944 = sst [smem:[#allocation11_spill]] %s2347_s18  ;;  %s2471_s22 = sadd.s32 4294967295, %s2359_s21   ;;  %s2359_s21 = sphi %s2456_s21, %s2971_s21   ;;  %s2355_s20 = sphi %s2454_s20, %s2973_s20   ;;  %s2351_s19 = sphi %s2452_s19, %s2975_s19   ;;  %s2347_s18 = sphi %s2450_s18, %s2974_s18  }
   0xc   : > { %2945 = sst [smem:[#allocation12_spill]] %s2355_s20  ;;  %s1859_s23 = sadd.s32 4294967294, %s2359_s21  }
   0xd   : > { %s2475_s24 = sadd.s32 1, %s2359_s21   ;;  %s67_s25 = sadd.s32 1, %s2355_s20 }
   0xe   : > { %2946 = sst [smem:[#allocation13_spill]] %s2475_s24  ;;  %s64_s26 = ssub.s32 %s2359_s21, %s2475_s24 }
   0xf   : > { %p74_p0 = scmp.ne.s32.totalorder %s2355_s20, %s2351_s19  ;;  %p65_p1 = scmp.eq.s32.totalorder %s64_s26, 0 }
  0x10   : > { %p75_p2 = scmp.eq.s32.totalorder %s2359_s21, 0  ;;  %p80_p3 = scmp.ne.s32.totalorder %s2351_s19, %s2347_s18 }
  0x11   : > { %p81_p4 = scmp.eq.s32.totalorder %s2471_s22, 0  ;;  %p382_p7 = scmp.eq.s32.totalorder %s2471_s22, 1 }
  0x12   : > { %s2487_s27 = scalar_select %p65_p1, %s2355_s20, %s67_s25  }
  0x13   : > { %p2489_p5 = por %p75_p2, %p74_p0  ;;  %p2493_p6 = por %p81_p4, %p80_p3 }
  0x14   : > { %2947 = sst [smem:[#allocation14_spill]] %s2487_s27  ;;  %p388_p8 = scmp.eq.s32.totalorder %s1859_s23, 1 }
  0x15   : > { %s2949_s29 = scalar_select %p2493_p6, 1, 0 }
  0x16   : > { %p2159_p10 = scmp.lt.s32.totalorder %s2359_s21, 2  ;;  %p2500_p11 = por %p382_p7, %p74_p0 }
  0x17   : > { %p2504_p12 = por %p388_p8, %p80_p3  ;;  %s2509_s17 = sand.u32 1, %s2355_s20  }
  0x18   : > { %s2950_s30 = scalar_select %p2500_p11, 1, 0 }
  0x19   : > { %s2952_s16 = scalar_select %p2504_p12, 1, 0 }
  0x1a   : > { %2951 = sst [smem:[#allocation15_spill]] %s2950_s30  ;;  %s2935_s25 = sshll.u32 %s2359_s21, 5 }
  0x1b   : > { %2953 = sst [smem:[#allocation16_spill]] %s2952_s16  ;;  %s2934_s26 = sshll.u32 %s2509_s17, 1 }
  0x1c   : > { %s2954_s1 = sld [smem:[#allocation17_spill]]  ;;  %s456_s18 = scalar_lea.vmem [#allocation2], %s2934_s26 }
  0x1d   : > { %s463_s15 = sshll.u32 %s456_s18, 4  ;;  %p2524_p13 = pnand %p2159_p10, %p2489_p5  ;;  %s2528_s15 = int_to_ptr.vmem [resolvable:$true] %s463_s15 }
  0x1e   : > { %s453_s27 = scalar_lea.sflag [#allocation3], %s2509_s17 }
  0x1f   : > { %p2237_p3 = pneg %p2524_p13 }
  0x22   : > { %s2518_s24 = scalar_lea.hbm %s2954_s1, %s2935_s25  ;;  %s2240_s26 = scalar_lea.hbm %s2954_s1, 64 }
  0x23   : > { %s2235_s23 = scalar_lea.hbm %s2518_s24, 32  ;;  %p2241_p5 = scmp.lt.s32.totalorder %s2518_s24, %s2954_s1 }
  0x24   : > { %p2236_p2 = scmp.ne.s32.totalorder %s2518_s24, %s2235_s23  ;;  %p2242_p8 = scmp.lt.s32.totalorder %s2240_s26, %s2235_s23 }
  0x26   : > { %p2238_p4 = pnand %p2237_p3, %p2236_p2  ;;  %p2243_p10 = por %p2242_p8, %p2241_p5 }
  0x28   : > { %p2239_p7 = pneg %p2238_p4 }
  0x2a   : > { %p2244_p9 = pnand %p2243_p10, %p2239_p7 }
  0x2c   : > { %2247 = shalt.err (!%p2244_p9)
}
  0x2d   : > { %s2248_s30 = scalar_lea.vmem %s2528_s15, 32  ;;  %s2361_s18 = smov [#allocation2]  }
  0x2e   : > { %p2249_p0 = scmp.ne.s32.totalorder %s2528_s15, %s2248_s30  ;;  %s2253_s28 = sshll.u32 %s2361_s18, 4  ;;  %s2254_s28 = int_to_ptr.vmem [resolvable:$false] %s2253_s28 }
  0x2f   : > { %s2255_s14 = scalar_lea.vmem %s2254_s28, 64  ;;  %p2256_p1 = scmp.lt.s32.totalorder %s2528_s15, %s2254_s28 }
  0x30   : > { %p2251_p2 = pnand %p2249_p0, %p2237_p3  ;;  %p2257_p12 = scmp.lt.s32.totalorder %s2255_s14, %s2248_s30 }
  0x32   : > { %p2252_p4 = pneg %p2251_p2  ;;  %p2258_p11 = por %p2257_p12, %p2256_p1 }
  0x34   : > { %p2259_p5 = pnand %p2258_p11, %p2252_p4 }
  0x36   : > { %2262 = shalt.err (!%p2259_p5)
}
  0x37   : > { %2151 = dma.hbm_to_vmem [thread:$0]  (!%p2524_p13), %s2518_s24, 32, %s2528_s15, %s453_s27  }
  0x38   : > { %p2956_p9 = scmp.lt.s32.totalorder %s2359_s21, 3  ;;  %p2957_p0 = scmp.ge.s32.totalorder %s2359_s21, 1 }
  0x39   : > { %s2959_s14 = sshll.u32 %s2359_s21, 5  ;;  %s2960_s23 = sshll.u32 %s2509_s17, 1 }
  0x3a   : > { %p2561_p7 = pnand %p2957_p0, %p2956_p9  ;;  %s2570_s26 = scalar_lea.hbm %s2915_s2, %s2959_s14 }
  0x3b   : > { %s474_s18 = scalar_lea.vmem [#allocation5], %s2960_s23  ;;  %s471_s15 = scalar_lea.sflag [#allocation6], %s2509_s17 }
  0x3c   : > { %s2958_s16 = scalar_select %p2561_p7, 1, 0 }
  0x3d   : > { %s481_s28 = sshll.u32 %s474_s18, 4  ;;  %s2263_s24 = scalar_lea.hbm %s2570_s26, 32  ;;  %s482_s28 = int_to_ptr.vmem [resolvable:$true] %s481_s28 }
  0x3e   : > { %p2264_p11 = scmp.ne.s32.totalorder %s2570_s26, %s2263_s24  ;;  %s2268_s30 = scalar_lea.hbm %s2915_s2, 64 }
  0x3f   : > { %p2269_p8 = scmp.lt.s32.totalorder %s2570_s26, %s2915_s2  ;;  %p2270_p10 = scmp.lt.s32.totalorder %s2268_s30, %s2263_s24 }
  0x40   : > { %p2266_p12 = pnand %p2264_p11, %p2237_p3 }
  0x41   : > { %p2271_p2 = por %p2270_p10, %p2269_p8 }
  0x42   : > { %p2267_p1 = pneg %p2266_p12 }
  0x44   : > { %p2272_p4 = pnand %p2271_p2, %p2267_p1 }
  0x46   : > { %2275 = shalt.err (!%p2272_p4)
}
  0x47   : > { %s2276_s23 = scalar_lea.vmem %s482_s28, 32  ;;  %s2362_s17 = smov [#allocation5]  }
  0x48   : > { %p2277_p5 = scmp.ne.s32.totalorder %s482_s28, %s2276_s23  ;;  %s2281_s18 = sshll.u32 %s2362_s17, 4  ;;  %s2282_s18 = int_to_ptr.vmem [resolvable:$false] %s2281_s18 }
  0x49   : > { %s2283_s1 = scalar_lea.vmem %s2282_s18, 64  ;;  %p2284_p11 = scmp.lt.s32.totalorder %s482_s28, %s2282_s18 }
  0x4a   : > { %p2279_p9 = pnand %p2277_p5, %p2237_p3  ;;  %p2285_p12 = scmp.lt.s32.totalorder %s2283_s1, %s2276_s23 }
  0x4c   : > { %p2280_p0 = pneg %p2279_p9  ;;  %p2286_p6 = por %p2285_p12, %p2284_p11 }
  0x4e   : > { %p2287_p7 = pnand %p2286_p6, %p2280_p0 }
  0x50   : > { %2290 = shalt.err (!%p2287_p7)
}
  0x51   : > { %2154 = dma.hbm_to_vmem [thread:$0]  (!%p2524_p13), %s2570_s26, 32, %s482_s28, %s471_s15  }
  0x52   : > { %p2961_p1 = scmp.ne.s32.totalorder %s2958_s16, 0 }
  0x53   : > { %s2596_s24 = sand.u32 (!%p2961_p1), 1, %s2351_s19   ;;  %p2962_p6 = scmp.ne.s32.totalorder (!%p2961_p1), %s2949_s29, 0 }
  0x54   : > { %490 = sbr.rel (%p2961_p1) target bundleno = 1995 (0x7cb), region = 80  ;;  %s2599_s27 = sshll.u32 (!%p2961_p1), %s2596_s24, 1 }
  0x55   : > { %s493_s30 = scalar_lea.sflag (!%p2961_p1), [#allocation3], %s2596_s24  ;;  %s496_s14 = scalar_lea.vmem (!%p2961_p1), [#allocation2], %s2599_s27 }
  0x59   : > { %2334 = dma.done.wait (%p2962_p6), %s493_s30, 32  }
  0x5a   : > { %2336 = vsyncadd (%p2962_p6), %s493_s30, 4294967264  ;;  %s502_s20 = scalar_lea.sflag [#allocation6], %s2596_s24  ;;  %s505_s16 = scalar_lea.vmem [#allocation5], %s2599_s27 }
  0x5b   : > { %2338 = dma.done.wait (%p2962_p6), %s502_s20, 32  }
  0x5c   : > { %2340 = vsyncadd (%p2962_p6), %s502_s20, 4294967264  ;;  %p562_p13 = scmp.lt.s32.totalorder %s2471_s22, 1  ;;  %vm575_vm0 = vcmask 261120   ;;  %v599_v12 = vld [vmem:[%s2920_s7 + $0x18] sm:$0xff]  ;;  %v598_v13 = vld [vmem:[%s2920_s7 + $0x10] sm:$0xff]  ;;  %vm723_vm1 = vcmask 523264  }
  0x5d   : > { %1990 = vmatprep.subr.mxu0 %v599_v12  ;;  %v597_v14 = vld [vmem:[%s2920_s7 + $0x8] sm:$0xff]  ;;  %v596_v15 = vld [vmem:[%s2920_s7] sm:$0xff]  ;;  %v715_v16 = vld [vmem:[%s2922_s9 + $0x38] sm:$0xff]  ;;  %s2366_s17 = smov 64   ;;  %vm2368_vm3 = vmmov 0   ;;  %s2963_s30 = sld [smem:[#allocation18_spill]] }
  0x5e   : > { %s563_s26 = scalar_select %p562_p13, %s2471_s22, 1  ;;  %1991 = vmatpush3.msra.mxu0 %v599_v12  ;;  %v714_v17 = vld [vmem:[%s2922_s9 + $0x30] sm:$0xff]  ;;  %2004 = vmatprep.subr.mxu1 %v715_v16  ;;  %v713_v18 = vld [vmem:[%s2922_s9 + $0x28] sm:$0xff]  ;;  %v712_v19 = vld [vmem:[%s2922_s9 + $0x20] sm:$0xff]  ;;  %vm1655_vm4 = vcmask 1041409  }
  0x5f   : > { %1992 = vmatprep.subr.mxu0 %v598_v13  ;;  %2005 = vmatpush3.msra.mxu1 %v715_v16  ;;  %v711_v32 = vld [vmem:[%s2922_s9 + $0x18] sm:$0xff]  ;;  %v710_v33 = vld [vmem:[%s2922_s9 + $0x10] sm:$0xff]  ;;  %v709_v34 = vld [vmem:[%s2922_s9 + $0x8] sm:$0xff]  ;;  %s1904_s20 = sshll.u32 %s2471_s22, 5  ;;  %s1741_s29 = scalar_lea.sflag [#allocation4], %s2596_s24 }
  0x60   : > { %s1907_s28 = sshll.u32 %s563_s26, 5  ;;  %1993 = vmatpush3.msra.mxu0 %v598_v13  ;;  %2006 = vmatprep.subr.mxu1 %v714_v17  ;;  %v708_v35 = vld [vmem:[%s2922_s9] sm:$0xff]  ;;  %v828_v36 = vld [vmem:[%s2924_s11 + $0x18] sm:$0xff]  ;;  %v827_v50 = vld [vmem:[%s2924_s11 + $0x10] sm:$0xff]  ;;  %s2365_s26 = smov 96  }
  0x61   : > { %s566_s23 = scalar_lea.vmem %s2913_s0, %s1907_s28  ;;  %1994 = vmatprep.subr.mxu0 %v597_v14  ;;  %2007 = vmatpush3.msra.mxu1 %v714_v17  ;;  %v1872_v37 = vld [vmem:[%s2921_s8] ss:$0 sm:$0xff]  ;;  %v826_v51 = vld [vmem:[%s2924_s11 + $0x8] sm:$0xff]  ;;  %v936_v53 = vld [vmem:[%s2918_s5 + $0x18] sm:$0xff]  ;;  %s2369_s18 = smov [#allocation7]  }
  0x62   : > { %v567_v0 = vld [vmem:[%s566_s23] sm:$0xff]  ;;  %v569_v1 = vld [vmem:[%s566_s23 + $0x10] sm:$0xff]  ;;  %v568_v2 = vld [vmem:[%s566_s23 + $0x8] sm:$0xff]  ;;  %1995 = vmatpush3.msra.mxu0 %v597_v14  ;;  %2008 = vmatprep.subr.mxu1 %v713_v18  ;;  %s2295_s1 = sshll.u32 %s2369_s18, 4  ;;  %s2296_s1 = int_to_ptr.vmem [resolvable:$false] %s2295_s1 }
  0x63   : > { %v571_v3 = vmul.f32 %v567_v0, %v567_v0  ;;  %v573_v4 = vmul.f32 %v569_v1, %v569_v1  ;;  %v572_v5 = vmul.f32 %v568_v2, %v568_v2  ;;  %v570_v6 = vld [vmem:[%s566_s23 + $0x18] sm:$0xff]  ;;  %1996 = vmatprep.subr.mxu0 %v596_v15  ;;  %2009 = vmatpush3.msra.mxu1 %v713_v18  ;;  %v825_v52 = vld [vmem:[%s2924_s11] sm:$0xff]  ;;  %v2363_v18 = vmov -1e+30   ;;  %s2965_s23 = sld [smem:[#allocation19_spill]]  ;;  %s2297_s22 = scalar_lea.vmem %s2296_s1, 64 }
  0x64   : > { %v574_v7 = vmul.f32 %v570_v6, %v570_v6  ;;  %1997 = vmatpush3.msra.mxu0 %v596_v15  ;;  %2010 = vmatprep.subr.mxu1 %v712_v19  ;;  %v1877_v54 = vld [vmem:[%s2923_s10] ss:$0 sm:$0xff]  ;;  %v1038_v15 = vlaneseq }
  0x65   : > { %v576_v8 = vsel %vm575_vm0, %v571_v3, 0.0  ;;  %v582_v9 = vsel %vm575_vm0, %v573_v4, 0.0  ;;  %v579_v10 = vsel %vm575_vm0, %v572_v5, 0.0  ;;  %2011 = vmatpush3.msra.mxu1 %v712_v19  ;;  %2026 = vmatprep.subr.mxu0 %v828_v36  ;;  %v934_v4 = vld [vmem:[%s2918_s5 + $0x8] sm:$0xff]  ;;  %v933_v5 = vld [vmem:[%s2918_s5] sm:$0xff] }
  0x66   : > { %577 = vadd.xlane.f32.xlu0 %v576_v8  ;;  %583 = vadd.xlane.f32.xlu1 %v582_v9  ;;  %v585_v11 = vsel %vm575_vm0, %v574_v7, 0.0  ;;  %v1882_v7 = vld [vmem:[%s2925_s12] ss:$0 sm:$0xff]  ;;  %v1039_v16 = vand.u32 127, %v1038_v15 }
  0x67   : > { %2012 = vmatprep.subr.mxu1 %v711_v32 }
  0x68   : > { %2013 = vmatpush3.msra.mxu1 %v711_v32  ;;  %vm1040_vm2 = vcmp.lt.s32.totalorder %v1039_v16, 8  ;;  %v1096_v32 = vld [vmem:[%s2919_s6 + $0x70] sm:$0xff] }
  0x69   : > { %2014 = vmatprep.subr.mxu1 %v710_v33  ;;  %v1041_v19 = vsel %vm1040_vm2, 0.0, %v2363_v18 }
  0x6a   : > { %580 = vadd.xlane.f32.xlu0 %v579_v10  ;;  %586 = vadd.xlane.f32.xlu1 %v585_v11 }
  0x6b   : > { %2015 = vmatpush3.msra.mxu1 %v710_v33  ;;  %v1095_v33 = vld [vmem:[%s2919_s6 + $0x68] sm:$0xff] }
  0x6c   : > { %2016 = vmatprep.subr.mxu1 %v709_v34 }
  0x6d   : > { %2017 = vmatpush3.msra.mxu1 %v709_v34  ;;  %v1094_v34 = vld [vmem:[%s2919_s6 + $0x60] sm:$0xff] }
  0x6e   : > { %2018 = vmatprep.subr.mxu1 %v708_v35 }
  0x6f   : > { %2019 = vmatpush3.msra.mxu1 %v708_v35  ;;  %v1093_v35 = vld [vmem:[%s2919_s6 + $0x58] sm:$0xff] }
  0xef   : > { %v578_v20 = vpop.xlane.xlu0 %577  ;;  %v584_v21 = vpop.xlane.xlu1 %583 }
  0xf0   : > { %2199 = vrsqrt.f32 %v578_v20 }
  0xf1   : > { %2201 = vrsqrt.f32 %v584_v21 }
  0xf3   : > { %v581_v22 = vpop.xlane.xlu0 %580  ;;  %v587_v23 = vpop.xlane.xlu1 %586 }
  0xf4   : > { %2203 = vrsqrt.f32 %v581_v22 }
  0xf5   : > { %2205 = vrsqrt.f32 %v587_v23 }
  0xfd   : > { %v2200_v24 = vpop.eup %2199 }
  0xfe   : > { %v2202_v25 = vpop.eup %2201  ;;  %v592_v26 = vmul.f32 %v2200_v24, %v567_v0 }
  0xff   : > { %v594_v28 = vmul.f32 %v2202_v25, %v569_v1  ;;  %v935_v1 = vld [vmem:[%s2918_s5 + $0x10] sm:$0xff] }
 0x100   : > { %1998 = vmatprep.mubr.msk.f32.mxu0 %vm575_vm0, %v592_v26 }
 0x101   : > { %v2204_v27 = vpop.eup %2203 }
 0x102   : > { %v2206_v29 = vpop.eup %2205  ;;  %v593_v30 = vmul.f32 %v2204_v27, %v568_v2 }
 0x103   : > { %v595_v31 = vmul.f32 %v2206_v29, %v570_v6 }
 0x104   : > { %1999 = vmatmul.mubr.msk.f32.vlgmr.msra.gmra.mxu0 %vm575_vm0, %v593_v30 }
 0x105   : > { %2001 = vmatprep.mubr.msk.f32.mxu0 %vm575_vm0, %v594_v28  ;;  %2027 = vmatpush3.msra.mxu0 %v828_v36  ;;  %v1092_v36 = vld [vmem:[%s2919_s6 + $0x50] sm:$0xff] }
 0x106   : > { %2028 = vmatprep.subr.mxu0 %v827_v50 }
 0x107   : > { %2029 = vmatpush3.msra.mxu0 %v827_v50 }
 0x108   : > { %2002 = vmatmul.mubr.msk.f32.gmra.mxu0 %vm575_vm0, %v595_v31  ;;  %2030 = vmatprep.subr.mxu0 %v826_v51  ;;  %v1097_v31 = vld [vmem:[%s2919_s6 + $0x78] sm:$0xff] }
 0x109   : > { %2031 = vmatpush3.msra.mxu0 %v826_v51  ;;  %2054 = vmatprep.subr.mxu1 %v1097_v31 }
 0x10a   : > { %2032 = vmatprep.subr.mxu0 %v825_v52 }
 0x10b   : > { %2033 = vmatpush3.msra.mxu0 %v825_v52 }
 0x10c   : > { %2040 = vmatprep.subr.mxu0 %v936_v53 }
 0x1c4   : > { %v2000_v38 = vpop.f32.mrf.mxu0 }
 0x1c5   : > { %v691_v39 = vadd.f32 %v2000_v38, %v1872_v37 }
 0x1c6   : > { %v685_v40 = vpop.f32.mrf.mxu0 }
 0x1c7   : > { %v686_v41 = vadd.f32 %v1872_v37, %v685_v40  ;;  %v705_v44 = vmax.f32 %v691_v39, 0.0 }
 0x1c8   : > { %v2003_v42 = vpop.f32.mrf.mxu0 }
 0x1c9   : > { %v704_v43 = vmax.f32 %v686_v41, 0.0  ;;  %v701_v45 = vadd.f32 %v2003_v42, %v1872_v37 }
 0x1ca   : > { %v695_v46 = vpop.f32.mrf.mxu0 }
 0x1cb   : > { %v696_v47 = vadd.f32 %v1872_v37, %v695_v46  ;;  %2020 = vmatprep.mubr.msk.f32.mxu1 %vm723_vm1, %v704_v43  ;;  %v707_v49 = vmax.f32 %v701_v45, 0.0  ;;  %v1091_v37 = vld [vmem:[%s2919_s6 + $0x48] sm:$0xff] }
 0x1cc   : > { %2021 = vmatmul.mubr.msk.f32.vlgmr.msra.gmra.mxu1 %vm723_vm1, %v705_v44 }
 0x1cd   : > { %v706_v48 = vmax.f32 %v696_v47, 0.0  ;;  %2055 = vmatpush3.msra.mxu1 %v1097_v31  ;;  %v1184_v31 = vld [vmem:[%s2926_s13 + $0x8] sm:$0xff] }
 0x1ce   : > { %2056 = vmatprep.subr.mxu1 %v1096_v32 }
 0x1cf   : > { %2023 = vmatprep.mubr.msk.f32.mxu1 %vm723_vm1, %v706_v48  ;;  %2057 = vmatpush3.msra.mxu1 %v1096_v32 }
 0x1d0   : > { %2024 = vmatmul.mubr.msk.f32.gmra.mxu1 %vm723_vm1, %v707_v49  ;;  %2058 = vmatprep.subr.mxu1 %v1095_v33 }
 0x1d1   : > { %2059 = vmatpush3.msra.mxu1 %v1095_v33 }
 0x1d2   : > { %2060 = vmatprep.subr.mxu1 %v1094_v34 }
 0x1d3   : > { %2061 = vmatpush3.msra.mxu1 %v1094_v34 }
 0x1d4   : > { %2062 = vmatprep.subr.mxu1 %v1093_v35 }
 0x1d5   : > { %2063 = vmatpush3.msra.mxu1 %v1093_v35 }
 0x1d6   : > { %2064 = vmatprep.subr.mxu1 %v1092_v36 }
 0x1d7   : > { %2065 = vmatpush3.msra.mxu1 %v1092_v36 }
 0x1d8   : > { %2066 = vmatprep.subr.mxu1 %v1091_v37 }
 0x1d9   : > { %2067 = vmatpush3.msra.mxu1 %v1091_v37 }
 0x28c   : > { %v2022_v55 = vpop.f32.mrf.mxu1 }
 0x28d   : > { %v808_v56 = vadd.f32 %v2022_v55, %v1877_v54  ;;  %v2364_v55 = vmov 1966171168  }
 0x28e   : > { %v802_v57 = vpop.f32.mrf.mxu1 }
 0x28f   : > { %v803_v58 = vadd.f32 %v1877_v54, %v802_v57  ;;  %v822_v61 = vmax.f32 %v808_v56, 0.0  ;;  %v1498_v56 = vunpack.c.l.s4 %v2364_v55  ;;  %v1089_v57 = vld [vmem:[%s2919_s6 + $0x38] sm:$0xff]  ;;  %v1578_v55 = vld [vmem:[%s2916_s3 + $0x10] sm:$0xff] }
 0x290   : > { %v2025_v59 = vpop.f32.mrf.mxu1 }
 0x291   : > { %v821_v60 = vmax.f32 %v803_v58, 0.0  ;;  %v818_v62 = vadd.f32 %v2025_v59, %v1877_v54  ;;  %v1088_v58 = vld [vmem:[%s2919_s6 + $0x30] sm:$0xff]  ;;  %v1499_v59 = vunpack.c.0.s8 %v1498_v56  ;;  %v1577_v56 = vld [vmem:[%s2916_s3 + $0x8] sm:$0xff] }
 0x292   : > { %v812_v63 = vpop.f32.mrf.mxu1 }
 0x293   : > { %v813_v0 = vadd.f32 %v1877_v54, %v812_v63  ;;  %2034 = vmatprep.mubr.msk.f32.mxu0 %vm575_vm0, %v821_v60  ;;  %v824_v3 = vmax.f32 %v818_v62, 0.0  ;;  %v1090_v54 = vld [vmem:[%s2919_s6 + $0x40] sm:$0xff]  ;;  %v1501_v60 = vshrl.u32 %v1038_v15, 7  ;;  %v1085_v63 = vld [vmem:[%s2919_s6 + $0x18] sm:$0xff] }
 0x294   : > { %2035 = vmatmul.mubr.msk.f32.vlgmr.msra.gmra.mxu0 %vm575_vm0, %v822_v61  ;;  %2068 = vmatprep.subr.mxu1 %v1090_v54  ;;  %v1087_v61 = vld [vmem:[%s2919_s6 + $0x28] sm:$0xff]  ;;  %v1086_v62 = vld [vmem:[%s2919_s6 + $0x20] sm:$0xff] }
 0x295   : > { %v823_v2 = vmax.f32 %v813_v0, 0.0  ;;  %2041 = vmatpush3.msra.mxu0 %v936_v53  ;;  %2069 = vmatpush3.msra.mxu1 %v1090_v54  ;;  %v1900_v0 = vld.sshfl [vmem:[%s505_s16] sm:$0x11 pattern:$0x75316420]  ;;  %v2367_v54 = vmov 0.0   ;;  %s1752_s16 = scalar_lea.hbm %s2965_s23, %s1904_s20 }
 0x296   : > { %2042 = vmatprep.subr.mxu0 %v935_v1  ;;  %2070 = vmatprep.subr.mxu1 %v1089_v57 }
 0x297   : > { %2037 = vmatprep.mubr.msk.f32.mxu0 %vm575_vm0, %v823_v2  ;;  %2043 = vmatpush3.msra.mxu0 %v935_v1  ;;  %v1502_v1 = vsub.s32 %v1499_v59, %v1501_v60  ;;  %v1496_v2 = vcombine.high %v1900_v0, %v1900_v0  ;;  %v1891_v59 = vld [vmem:[%s2963_s30] ss:$0 sm:$0xff] }
 0x298   : > { %2038 = vmatmul.mubr.msk.f32.gmra.mxu0 %vm575_vm0, %v824_v3  ;;  %2044 = vmatprep.subr.mxu0 %v934_v4  ;;  %v1084_v3 = vld [vmem:[%s2919_s6 + $0x10] sm:$0xff] }
 0x299   : > { %2045 = vmatpush3.msra.mxu0 %v934_v4  ;;  %2071 = vmatpush3.msra.mxu1 %v1089_v57  ;;  %v1503_v4 = vrot.slane %v1900_v0, %v1502_v1  ;;  %v1576_v57 = vld [vmem:[%s2916_s3] sm:$0xff] }
 0x29a   : > { %2046 = vmatprep.subr.mxu0 %v933_v5  ;;  %2072 = vmatprep.subr.mxu1 %v1088_v58 }
 0x29b   : > { %2047 = vmatpush3.msra.mxu0 %v933_v5  ;;  %2073 = vmatpush3.msra.mxu1 %v1088_v58  ;;  %v1513_v5 = vsub.s32 0, %v1501_v60  ;;  %v1575_v58 = vld [vmem:[%s496_s14] sm:$0x3]  ;;  %s2964_s14 = sld [smem:[#allocation15_spill]] }
 0x29c   : > { %2074 = vmatprep.subr.mxu1 %v1087_v61 }
 0x29d   : > { %2075 = vmatpush3.msra.mxu1 %v1087_v61 }
 0x29e   : > { %2076 = vmatprep.subr.mxu1 %v1086_v62 }
 0x29f   : > { %2077 = vmatpush3.msra.mxu1 %v1086_v62 }
 0x2a0   : > { %2078 = vmatprep.subr.mxu1 %v1085_v63 }
 0x2a1   : > { %2079 = vmatpush3.msra.mxu1 %v1085_v63  ;;  %p2966_p7 = scmp.ne.s32.totalorder %s2964_s14, 0 }
 0x2a2   : > { %2080 = vmatprep.subr.mxu1 %v1084_v3 }
 0x2a3   : > { %2081 = vmatpush3.msra.mxu1 %v1084_v3 }
 0x354   : > { %v2036_v6 = vpop.f32.mrf.mxu0 }
 0x355   : > { %v2701_v10 = vadd.f32 %v2036_v6, %v1882_v7  ;;  %v1083_v6 = vld [vmem:[%s2919_s6 + $0x8] sm:$0xff] }
 0x356   : > { %v914_v8 = vpop.f32.mrf.mxu0  ;;  %2082 = vmatprep.subr.mxu1 %v1083_v6 }
 0x357   : > { %v2699_v9 = vadd.f32 %v1882_v7, %v914_v8  ;;  %2083 = vmatpush3.msra.mxu1 %v1083_v6  ;;  %v1082_v8 = vld [vmem:[%s2919_s6] sm:$0xff] }
 0x358   : > { %v2039_v11 = vpop.f32.mrf.mxu0  ;;  %2084 = vmatprep.subr.mxu1 %v1082_v8 }
 0x359   : > { %2048 = vmatprep.mubr.msk.f32.mxu0 %vm575_vm0, %v2699_v9  ;;  %v2709_v14 = vadd.f32 %v2039_v11, %v1882_v7  ;;  %v1514_v11 = vrot.slane %v1503_v4, %v1513_v5  ;;  %2085 = vmatpush3.msra.mxu1 %v1082_v8 }
 0x35a   : > { %v924_v12 = vpop.f32.mrf.mxu0  ;;  %2049 = vmatmul.mubr.msk.f32.vlgmr.msra.gmra.mxu0 %vm575_vm0, %v2701_v10 }
 0x35b   : > { %v2707_v13 = vadd.f32 %v1882_v7, %v924_v12  ;;  %v1510_v7 = vrot.slane %v1496_v2, %v1502_v1 }
 0x35d   : > { %2051 = vmatprep.mubr.msk.f32.mxu0 %vm575_vm0, %v2707_v13  ;;  %v1518_v12 = vrot.slane %v1510_v7, %v1513_v5 }
 0x35e   : > { %2052 = vmatmul.mubr.msk.f32.gmra.mxu0 %vm575_vm0, %v2709_v14 }
 0x41a   : > { %v2050_v17 = vpop.f32.mrf.mxu0 }
 0x41b   : > { %v1035_v20 = vmul.f32 0.17677669, %v2050_v17 }
 0x41c   : > { %v1015_v21 = vpop.f32.mrf.mxu0 }
 0x41d   : > { %v1034_v22 = vmul.f32 0.17677669, %v1015_v21  ;;  %v1043_v23 = vadd.f32 %v1041_v19, %v1035_v20 }
 0x41e   : > { %v2053_v24 = vpop.f32.mrf.mxu0 }
 0x41f   : > { %v1037_v25 = vmul.f32 0.17677669, %v2053_v24  ;;  %1048 = vmax.xlane.f32.xlu1 %v1043_v23  ;;  %v1042_v26 = vadd.f32 %v1041_v19, %v1034_v22 }
 0x420   : > { %v1025_v27 = vpop.f32.mrf.mxu0 }
 0x421   : > { %v1036_v28 = vmul.f32 0.17677669, %v1025_v27  ;;  %1046 = vmax.xlane.f32.xlu0 %v1042_v26  ;;  %v1045_v29 = vadd.f32 %v1041_v19, %v1037_v25 }
 0x423   : > { %1052 = vmax.xlane.f32.xlu1 %v1045_v29  ;;  %v1044_v30 = vadd.f32 %v1041_v19, %v1036_v28  ;;  %v1186_v28 = vld [vmem:[%s2926_s13 + $0x18] sm:$0xff] }
 0x424   : > { %2092 = vmatprep.subr.mxu0 %v1186_v28 }
 0x425   : > { %1050 = vmax.xlane.f32.xlu0 %v1044_v30  ;;  %2093 = vmatpush3.msra.mxu0 %v1186_v28 }
 0x4a8   : > { %v1049_v38 = vpop.xlane.xlu1 %1048 }
 0x4a9   : > { %v1055_v39 = vsub.f32 %v1043_v23, %v1049_v38  ;;  %v1183_v38 = vld [vmem:[%s2926_s13] sm:$0xff] }
 0x4aa   : > { %v1047_v40 = vpop.xlane.xlu0 %1046 }
 0x4ab   : > { %v1060_v41 = vmul.f32 1.442695, %v1055_v39  ;;  %v1054_v42 = vsub.f32 %v1042_v26, %v1047_v40 }
 0x4ac   : > { %v1053_v43 = vpop.xlane.xlu1 %1052 }
 0x4ad   : > { %2207 = vpow2.f32 %v1060_v41  ;;  %v1058_v44 = vmul.f32 1.442695, %v1054_v42  ;;  %v1057_v45 = vsub.f32 %v1045_v29, %v1053_v43 }
 0x4ae   : > { %v1051_v46 = vpop.xlane.xlu0 %1050 }
 0x4af   : > { %2209 = vpow2.f32 %v1058_v44  ;;  %v1064_v47 = vmul.f32 1.442695, %v1057_v45  ;;  %v1056_v48 = vsub.f32 %v1044_v30, %v1051_v46  ;;  %v1185_v30 = vld [vmem:[%s2926_s13 + $0x10] sm:$0xff] }
 0x4b0   : > { %2094 = vmatprep.subr.mxu0 %v1185_v30 }
 0x4b1   : > { %2211 = vpow2.f32 %v1064_v47  ;;  %v1062_v49 = vmul.f32 1.442695, %v1056_v48  ;;  %2095 = vmatpush3.msra.mxu0 %v1185_v30  ;;  %v1334_v48 = vld [vmem:[%s2917_s4 + $0x10] sm:$0xff] }
 0x4b2   : > { %2096 = vmatprep.subr.mxu0 %v1184_v31 }
 0x4b3   : > { %2213 = vpow2.f32 %v1062_v49  ;;  %2097 = vmatpush3.msra.mxu0 %v1184_v31 }
 0x4b4   : > { %2098 = vmatprep.subr.mxu0 %v1183_v38 }
 0x4b5   : > { %2099 = vmatpush3.msra.mxu0 %v1183_v38 }
 0x4ba   : > { %v2737_v50 = vpop.eup %2207 }
 0x4bb   : > { %1068 = vadd.xlane.f32.xlu1 %v2737_v50 }
 0x4bc   : > { %v2740_v51 = vpop.eup %2209 }
 0x4bd   : > { %1066 = vadd.xlane.f32.xlu0 %v2740_v51 }
 0x4be   : > { %v2743_v52 = vpop.eup %2211 }
 0x4bf   : > { %1072 = vadd.xlane.f32.xlu1 %v2743_v52 }
 0x4c0   : > { %v2746_v53 = vpop.eup %2213 }
 0x4c1   : > { %1070 = vadd.xlane.f32.xlu0 %v2746_v53 }
 0x4d0   : > { %1338 = vrot.lane.b32.xlu1 %v2701_v10, %s2365_s26 }
 0x4d4   : > { %1340 = vrot.lane.b32.xlu1 %v2707_v13, %s2365_s26 }
 0x4d7   : > { %1336 = vrot.lane.b32.xlu0 %v2699_v9, %s2365_s26 }
 0x4d8   : > { %1342 = vrot.lane.b32.xlu1 %v2709_v14, %s2365_s26  ;;  %s561_s26 = scalar_lea.vmem [#allocation7], %s2599_s27 }
 0x4d9   : > { %s1754_s28 = sshll.u32 %s561_s26, 4  ;;  %s1755_s28 = int_to_ptr.vmem [resolvable:$true] %s1754_s28 }
 0x4da   : > { %p2298_p2 = scmp.lt.s32.totalorder %s1755_s28, %s2296_s1 }
 0x4db   : > { %1519 = vrot.lane.b32.xlu0 %v1514_v11, %s2366_s17 }
 0x4dc   : > { %1521 = vrot.lane.b32.xlu1 %v1518_v12, %s2366_s17 }
 0x544   : > { %v1069_v15 = vpop.xlane.xlu1 %1068 }
 0x545   : > { %2215 = vrcp.f32 %v1069_v15 }
 0x546   : > { %v1067_v16 = vpop.xlane.xlu0 %1066 }
 0x547   : > { %2217 = vrcp.f32 %v1067_v16 }
 0x548   : > { %v1073_v17 = vpop.xlane.xlu1 %1072 }
 0x549   : > { %2219 = vrcp.f32 %v1073_v17 }
 0x54a   : > { %v1071_v18 = vpop.xlane.xlu0 %1070 }
 0x54b   : > { %2221 = vrcp.f32 %v1071_v18 }
 0x54c   : > { %v2785_v19 = vpop.permute.xlu1 %1338 }
 0x54e   : > { %v2787_v20 = vpop.permute.xlu0 %1336 }
 0x550   : > { %v2789_v21 = vpop.permute.xlu1 %1340 }
 0x552   : > { %v1520_v22 = vpop.permute.xlu0 %1519  ;;  %v2216_v23 = vpop.eup %2215 }
 0x553   : > { %v1525_v24 = vmul.f32 %v1520_v22, %v2699_v9  ;;  %v1526_v25 = vmul.f32 %v1520_v22, %v2701_v10  ;;  %v1079_v9 = vmul.f32 %v2216_v23, %v2737_v50  ;;  %v1333_v50 = vld [vmem:[%s2917_s4 + $0x8] sm:$0xff] }
 0x554   : > { %v2218_v26 = vpop.eup %2217  ;;  %v2793_v27 = vpop.permute.xlu1 %1342 }
 0x555   : > { %1535 = vrot.lane.b32.xlu1 %v1526_v25, %s2366_s17  ;;  %1533 = vrot.lane.b32.xlu0 %v1525_v24, %s2366_s17  ;;  %v1078_v29 = vmul.f32 %v2218_v26, %v2740_v51 }
 0x556   : > { %v2220_v10 = vpop.eup %2219 }
 0x557   : > { %2086 = vmatprep.mubr.f32.mxu1 %v1078_v29  ;;  %v1081_v37 = vmul.f32 %v2220_v10, %v2743_v52  ;;  %v1332_v52 = vld [vmem:[%s2917_s4] sm:$0xff] }
 0x558   : > { %v2222_v32 = vpop.eup %2221  ;;  %v1522_v33 = vpop.permute.xlu1 %1521  ;;  %2087 = vmatmul.mubr.f32.vlgmr.msra.gmra.mxu1 %v1079_v9 }
 0x559   : > { %v1527_v34 = vmul.f32 %v1522_v33, %v2707_v13  ;;  %v1528_v35 = vmul.f32 %v1522_v33, %v2709_v14  ;;  %v1080_v36 = vmul.f32 %v2222_v32, %v2746_v53  ;;  %v1335_v13 = vld [vmem:[%s2917_s4 + $0x18] sm:$0xff] }
 0x55a   : > { %2106 = vmatprep.subr.mxu0 %v1335_v13  ;;  %v1579_v53 = vld [vmem:[%s2916_s3 + $0x18] sm:$0xff] }
 0x55b   : > { %2089 = vmatprep.mubr.f32.mxu1 %v1080_v36  ;;  %1539 = vrot.lane.b32.xlu1 %v1528_v35, %s2366_s17 }
 0x55c   : > { %1537 = vrot.lane.b32.xlu0 %v1527_v34, %s2366_s17  ;;  %2090 = vmatmul.mubr.f32.gmra.mxu1 %v1081_v37  ;;  %s2291_s17 = scalar_lea.vmem %s1755_s28, 32 }
 0x55d   : > { %p2292_p3 = scmp.ne.s32.totalorder %s1755_s28, %s2291_s17  ;;  %p2299_p4 = scmp.lt.s32.totalorder %s2297_s22, %s2291_s17 }
 0x55f   : > { %p2293_p8 = pnand %p2292_p3, %p2966_p7  ;;  %p2300_p5 = por %p2299_p4, %p2298_p2 }
 0x561   : > { %p2294_p10 = pneg %p2293_p8 }
 0x563   : > { %p2301_p9 = pnand %p2300_p5, %p2294_p10 }
 0x5c7   : > { %v1536_v14 = vpop.permute.xlu1 %1535  ;;  %v1534_v39 = vpop.permute.xlu0 %1533 }
 0x5c8   : > { %v1548_v40 = vsel %vm575_vm0, %v1536_v14, 0.0  ;;  %v1545_v41 = vsel %vm575_vm0, %v1534_v39, 0.0 }
 0x5c9   : > { %1549 = vadd.xlane.f32.xlu1 %v1548_v40  ;;  %1546 = vadd.xlane.f32.xlu0 %v1545_v41 }
 0x5cd   : > { %v1540_v44 = vpop.permute.xlu1 %1539 }
 0x5ce   : > { %v1538_v42 = vpop.permute.xlu0 %1537  ;;  %v1554_v45 = vsel %vm575_vm0, %v1540_v44, 0.0 }
 0x5cf   : > { %v1551_v43 = vsel %vm575_vm0, %v1538_v42, 0.0 }
 0x5d0   : > { %1552 = vadd.xlane.f32.xlu0 %v1551_v43 }
 0x5d4   : > { %1555 = vadd.xlane.f32.xlu0 %v1554_v45 }
 0x618   : > { %v2088_v46 = vpop.f32.mrf.mxu1 }
 0x61a   : > { %v1164_v47 = vpop.f32.mrf.mxu1 }
 0x61b   : > { %2100 = vmatprep.mubr.msk.f32.mxu0 %vm575_vm0, %v1164_v47 }
 0x61c   : > { %v2091_v49 = vpop.f32.mrf.mxu1  ;;  %2101 = vmatmul.mubr.msk.f32.vlgmr.msra.gmra.mxu0 %vm575_vm0, %v2088_v46 }
 0x61d   : > { %2107 = vmatpush3.msra.mxu0 %v1335_v13 }
 0x61e   : > { %v1174_v51 = vpop.f32.mrf.mxu1  ;;  %2108 = vmatprep.subr.mxu0 %v1334_v48 }
 0x61f   : > { %2103 = vmatprep.mubr.msk.f32.mxu0 %vm575_vm0, %v1174_v51  ;;  %2109 = vmatpush3.msra.mxu0 %v1334_v48 }
 0x620   : > { %2104 = vmatmul.mubr.msk.f32.gmra.mxu0 %vm575_vm0, %v2091_v49  ;;  %2110 = vmatprep.subr.mxu0 %v1333_v50 }
 0x621   : > { %2111 = vmatpush3.msra.mxu0 %v1333_v50  ;;  %2114 = vmatprep.mubr.msk.f32.mxu0 %vm575_vm0, %v2787_v20 }
 0x622   : > { %2112 = vmatprep.subr.mxu0 %v1332_v52 }
 0x623   : > { %2113 = vmatpush3.msra.mxu0 %v1332_v52 }
 0x624   : > { %2115 = vmatmul.mubr.msk.f32.vlgmr.msra.gmra.mxu0 %vm575_vm0, %v2785_v19  ;;  %2120 = vmatprep.subr.mxu0 %v2367_v54 }
 0x625   : > { %2117 = vmatprep.mubr.msk.f32.mxu0 %vm575_vm0, %v2789_v21  ;;  %2121 = vmatpush3.msra.mxu0 %v1579_v53 }
 0x626   : > { %2122 = vmatprep.subr.mxu0 %v2367_v54 }
 0x627   : > { %2123 = vmatpush3.msra.mxu0 %v1578_v55 }
 0x628   : > { %2118 = vmatmul.mubr.msk.f32.gmra.mxu0 %vm575_vm0, %v2793_v27  ;;  %2124 = vmatprep.subr.mxu0 %v2367_v54 }
 0x629   : > { %2125 = vmatpush3.msra.mxu0 %v1577_v56  ;;  %2128 = vmatprep.mubr.msk.f32.mxu0 %vm2368_vm3, %v2367_v54 }
 0x62a   : > { %2126 = vmatprep.subr.mxu0 %v2367_v54 }
 0x62b   : > { %2127 = vmatpush3.msra.mxu0 %v1576_v57 }
 0x62c   : > { %2129 = vmatmul.mubr.msk.f32.vlgmr.msra.gmra.mxu0 %vm575_vm0, %v1575_v58  ;;  %2131 = vmatprep.subr.mxu0 %v2367_v54 }
 0x62d   : > { %2132 = vmatpush3.msra.mxu0 %v1579_v53  ;;  %2139 = vmatprep.mubr.msk.f32.mxu0 %vm2368_vm3, %v2367_v54 }
 0x62e   : > { %2133 = vmatprep.subr.mxu0 %v2367_v54 }
 0x62f   : > { %2134 = vmatpush3.msra.mxu0 %v1578_v55 }
 0x630   : > { %2135 = vmatprep.subr.mxu0 %v2367_v54 }
 0x631   : > { %2136 = vmatpush3.msra.mxu0 %v1577_v56 }
 0x632   : > { %2137 = vmatprep.subr.mxu0 %v2367_v54 }
 0x633   : > { %2138 = vmatpush3.msra.mxu0 %v1576_v57 }
 0x6dc   : > { %v2102_v60 = vpop.f32.mrf.mxu0 }
 0x6dd   : > { %v1278_v61 = vadd.f32 %v2102_v60, %v1891_v59 }
 0x6de   : > { %v1272_v62 = vpop.f32.mrf.mxu0 }
 0x6df   : > { %v1273_v63 = vadd.f32 %v1891_v59, %v1272_v62  ;;  %v1292_v0 = vsel %vm575_vm0, %v1278_v61, 0.0  ;;  %v1313_v2 = vsel %vm575_vm0, %v1278_v61, -inf }
 0x6e0   : > { %v2105_v1 = vpop.f32.mrf.mxu0 }
 0x6e1   : > { %v1291_v3 = vsel %vm575_vm0, %v1273_v63, 0.0  ;;  %v1312_v4 = vsel %vm575_vm0, %v1273_v63, -inf  ;;  %v1288_v5 = vadd.f32 %v2105_v1, %v1891_v59 }
 0x6e2   : > { %v1293_v6 = vadd.f32 %v1292_v0, %v1291_v3  ;;  %v1314_v7 = vmax.f32 %v1312_v4, %v1313_v2  ;;  %v1282_v8 = vpop.f32.mrf.mxu0 }
 0x6e3   : > { %v1283_v11 = vadd.f32 %v1891_v59, %v1282_v8  ;;  %v1301_v17 = vsel %vm575_vm0, %v1288_v5, 0.0  ;;  %v1322_v18 = vsel %vm575_vm0, %v1288_v5, -inf }
 0x6e4   : > { %v1294_v12 = vrot.slane %v1293_v6, 4  ;;  %v1315_v15 = vrot.slane %v1314_v7, 4  ;;  %v2116_v16 = vpop.f32.mrf.mxu0 }
 0x6e5   : > { %v1300_v19 = vsel %vm575_vm0, %v1283_v11, 0.0  ;;  %v1321_v20 = vsel %vm575_vm0, %v1283_v11, -inf  ;;  %v1438_v26 = vmul.f32 0.17677669, %v2116_v16 }
 0x6e6   : > { %v1295_v21 = vadd.f32 %v1294_v12, %v1293_v6  ;;  %v1316_v22 = vmax.f32 %v1314_v7, %v1315_v15  ;;  %v1302_v23 = vadd.f32 %v1301_v17, %v1300_v19  ;;  %v1323_v24 = vmax.f32 %v1321_v20, %v1322_v18  ;;  %v1418_v25 = vpop.f32.mrf.mxu0 }
 0x6e7   : > { %v1437_v27 = vmul.f32 0.17677669, %v1418_v25 }
 0x6e8   : > { %v1296_v28 = vrot.slane %v1295_v21, 2  ;;  %v1317_v29 = vrot.slane %v1316_v22, 2  ;;  %v1303_v30 = vrot.slane %v1302_v23, 4  ;;  %v1324_v9 = vrot.slane %v1323_v24, 4  ;;  %v2119_v10 = vpop.f32.mrf.mxu0 }
 0x6e9   : > { %v1441_v31 = vmax.f32 %v1437_v27, %v1438_v26  ;;  %v1440_v37 = vmul.f32 0.17677669, %v2119_v10 }
 0x6ea   : > { %v1297_v32 = vadd.f32 %v1296_v28, %v1295_v21  ;;  %v1304_v33 = vadd.f32 %v1303_v30, %v1302_v23  ;;  %v1325_v34 = vmax.f32 %v1323_v24, %v1324_v9  ;;  %v1428_v35 = vpop.f32.mrf.mxu0  ;;  %v1318_v14 = vmax.f32 %v1316_v22, %v1317_v29 }
 0x6eb   : > { %v1442_v36 = vrot.slane %v1441_v31, 4  ;;  %v1439_v38 = vmul.f32 0.17677669, %v1428_v35 }
 0x6ec   : > { %v1298_v13 = vrot.slane %v1297_v32, 1  ;;  %v1305_v39 = vrot.slane %v1304_v33, 2  ;;  %v1326_v40 = vrot.slane %v1325_v34, 2  ;;  %v2871_v41 = vpop.f32.mrf.mxu0  ;;  %v1319_v50 = vrot.slane %v1318_v14, 1 }
 0x6ed   : > { %v1443_v42 = vmax.f32 %v1441_v31, %v1442_v36  ;;  %v1448_v43 = vmax.f32 %v1439_v38, %v1440_v37 }
 0x6ee   : > { %v1299_v44 = vadd.f32 %v1298_v13, %v1297_v32  ;;  %v1306_v45 = vadd.f32 %v1305_v39, %v1304_v33  ;;  %v1327_v46 = vmax.f32 %v1325_v34, %v1326_v40  ;;  %v2130_v47 = vpop.f32.mrf.mxu0  ;;  %v1320_v59 = vmax.f32 %v1318_v14, %v1319_v50  ;;  %v1547_v33 = vpop.xlane.xlu0 %1546 }
 0x6ef   : > { %v1444_v48 = vrot.slane %v1443_v42, 2  ;;  %v1449_v49 = vrot.slane %v1448_v43, 4 }
 0x6f0   : > { %v1307_v51 = vrot.slane %v1306_v45, 1  ;;  %v1328_v52 = vrot.slane %v1327_v46, 1  ;;  %v1310_v55 = vmul.f32 0.0625, %v1299_v44 }
 0x6f1   : > { %v1445_v53 = vmax.f32 %v1443_v42, %v1444_v48  ;;  %v1450_v54 = vmax.f32 %v1448_v43, %v1449_v49 }
 0x6f2   : > { %v1308_v56 = vadd.f32 %v1307_v51, %v1306_v45  ;;  %v1329_v61 = vmax.f32 %v1327_v46, %v1328_v52  ;;  %v1330_v0 = vadd.f32 %v1320_v59, %v1310_v55  ;;  %v1553_v35 = vpop.xlane.xlu0 %1552 }
 0x6f3   : > { %v1446_v57 = vrot.slane %v1445_v53, 1  ;;  %v1451_v58 = vrot.slane %v1450_v54, 2 }
 0x6f4   : > { %v1311_v60 = vmul.f32 0.0625, %v1308_v56 }
 0x6f5   : > { %v1447_v62 = vmax.f32 %v1445_v53, %v1446_v57  ;;  %v1452_v63 = vmax.f32 %v1450_v54, %v1451_v58 }
 0x6f6   : > { %v1331_v1 = vadd.f32 %v1329_v61, %v1311_v60  ;;  %v1556_v44 = vpop.xlane.xlu0 %1555  ;;  %v1729_v60 = vmul.f32 14.285714, %v2871_v41 }
 0x6f7   : > { %v1455_v2 = vsub.f32 %v1437_v27, %v1447_v62  ;;  %v1456_v3 = vsub.f32 %v1438_v26, %v1447_v62  ;;  %v1453_v4 = vrot.slane %v1452_v63, 1 }
 0x6f8   : > { %v1656_v5 = vsel %vm1655_vm4, %v1331_v1, %v1330_v0 }
 0x6f9   : > { %v1459_v6 = vmul.f32 1.442695, %v1455_v2  ;;  %v1461_v7 = vmul.f32 1.442695, %v1456_v3  ;;  %v1454_v8 = vmax.f32 %v1452_v63, %v1453_v4  ;;  %2140 = vmatmul.mubr.msk.f32.vlgmr.msra.gmra.mxu0 %vm575_vm0, %v1656_v5 }
 0x6fb   : > { %2223 = vpow2.f32 %v1459_v6  ;;  %v1457_v11 = vsub.f32 %v1439_v38, %v1454_v8  ;;  %v1458_v12 = vsub.f32 %v1440_v37, %v1454_v8  ;;  %v1550_v38 = vpop.xlane.xlu1 %1549 }
 0x6fc   : > { %2225 = vpow2.f32 %v1461_v7 }
 0x6fd   : > { %v1463_v15 = vmul.f32 1.442695, %v1457_v11  ;;  %v1465_v16 = vmul.f32 1.442695, %v1458_v12 }
 0x6ff   : > { %2227 = vpow2.f32 %v1463_v15 }
 0x700   : > { %2229 = vpow2.f32 %v1465_v16 }
 0x708   : > { %v2224_v17 = vpop.eup %2223 }
 0x709   : > { %v2226_v18 = vpop.eup %2225 }
 0x70a   : > { %v1467_v19 = vadd.f32 %v2226_v18, %v2224_v17 }
 0x70c   : > { %v2228_v20 = vpop.eup %2227  ;;  %v1468_v21 = vrot.slane %v1467_v19, 4 }
 0x70d   : > { %v2230_v22 = vpop.eup %2229 }
 0x70e   : > { %v1469_v23 = vadd.f32 %v1468_v21, %v1467_v19  ;;  %v1474_v24 = vadd.f32 %v2230_v22, %v2228_v20 }
 0x710   : > { %v1470_v25 = vrot.slane %v1469_v23, 2  ;;  %v1475_v26 = vrot.slane %v1474_v24, 4 }
 0x712   : > { %v1471_v27 = vadd.f32 %v1470_v25, %v1469_v23  ;;  %v1476_v28 = vadd.f32 %v1475_v26, %v1474_v24 }
 0x714   : > { %v1472_v29 = vrot.slane %v1471_v27, 1  ;;  %v1477_v30 = vrot.slane %v1476_v28, 2 }
 0x716   : > { %v1473_v9 = vadd.f32 %v1472_v29, %v1471_v27  ;;  %v1478_v10 = vadd.f32 %v1477_v30, %v1476_v28 }
 0x718   : > { %2231 = vrcp.f32 %v1473_v9  ;;  %v1479_v31 = vrot.slane %v1478_v10, 1 }
 0x71a   : > { %v1480_v32 = vadd.f32 %v1479_v31, %v1478_v10 }
 0x71c   : > { %2233 = vrcp.f32 %v1480_v32 }
 0x725   : > { %v2232_v34 = vpop.eup %2231 }
 0x726   : > { %v1483_v36 = vmul.f32 %v2232_v34, %v2224_v17  ;;  %v1484_v37 = vmul.f32 %v2232_v34, %v2226_v18 }
 0x728   : > { %v1557_v13 = vmul.f32 %v1547_v33, %v1483_v36  ;;  %v1558_v14 = vmul.f32 %v1550_v38, %v1484_v37 }
 0x729   : > { %v2234_v39 = vpop.eup %2233 }
 0x72a   : > { %v1485_v40 = vmul.f32 %v2234_v39, %v2228_v20  ;;  %v1486_v42 = vmul.f32 %v2234_v39, %v2230_v22  ;;  %v1561_v43 = vadd.f32 %v1558_v14, %v1557_v13 }
 0x72c   : > { %v1559_v45 = vmul.f32 %v1553_v35, %v1485_v40  ;;  %v1560_v46 = vmul.f32 %v1556_v44, %v1486_v42  ;;  %v1562_v47 = vrot.slane %v1561_v43, 4 }
 0x72e   : > { %v1563_v48 = vadd.f32 %v1562_v47, %v1561_v43  ;;  %v1568_v49 = vadd.f32 %v1560_v46, %v1559_v45 }
 0x730   : > { %v1564_v50 = vrot.slane %v1563_v48, 2  ;;  %v1569_v51 = vrot.slane %v1568_v49, 4 }
 0x732   : > { %v1565_v52 = vadd.f32 %v1564_v50, %v1563_v48  ;;  %v1570_v53 = vadd.f32 %v1569_v51, %v1568_v49 }
 0x734   : > { %v1566_v54 = vrot.slane %v1565_v52, 1  ;;  %v1571_v55 = vrot.slane %v1570_v53, 2 }
 0x736   : > { %v1572_v56 = vadd.f32 %v1571_v55, %v1570_v53  ;;  %v1567_v57 = vadd.f32 %v1566_v54, %v1565_v52 }
 0x738   : > { %v1573_v58 = vrot.slane %v1572_v56, 1  ;;  %v1730_v61 = vmul.f32 7.142857, %v1567_v57 }
 0x73a   : > { %v1574_v59 = vadd.f32 %v1573_v58, %v1572_v56 }
 0x73c   : > { %v1731_v62 = vmul.f32 7.142857, %v1574_v59 }
 0x73e   : > { %v1734_v63 = vsel %vm1655_vm4, %v1731_v62, %v1730_v61 }
 0x73f   : > { %v1736_v0 = vadd.f32 %v1734_v63, %v1729_v60 }
 0x7b9   : > { %v1725_v1 = vpop.f32.mrf.mxu0 }
 0x7ba   : > { %v1737_v2 = vmul.f32 3.5714285, %v1725_v1 }
 0x7bb   : > { %v2141_v3 = vpop.f32.mrf.mxu0 }
 0x7bc   : > { %v1738_v4 = vadd.f32 %v1737_v2, %v1736_v0 }
 0x7be   : > { %1739 = vst [vmem:[%s561_s26] sm:$0x3] %v1738_v4 }
 0x7bf   : > { %2304 = shalt.err (!%p2301_p9)
}
 0x7c0   : > { %s2305_s27 = scalar_lea.hbm %s1752_s16, 32  ;;  %s2309_s20 = scalar_lea.hbm %s2965_s23, 64 }
 0x7c1   : > { %p2306_p0 = scmp.ne.s32.totalorder %s1752_s16, %s2305_s27  ;;  %p2310_p1 = scmp.lt.s32.totalorder %s1752_s16, %s2965_s23 }
 0x7c2   : > { %p2311_p6 = scmp.lt.s32.totalorder %s2309_s20, %s2305_s27 }
 0x7c3   : > { %p2307_p11 = pnand %p2306_p0, %p2966_p7 }
 0x7c4   : > { %p2312_p13 = por %p2311_p6, %p2310_p1 }
 0x7c5   : > { %p2308_p12 = pneg %p2307_p11 }
 0x7c7   : > { %p2313_p3 = pnand %p2312_p13, %p2308_p12 }
 0x7c9   : > { %2316 = shalt.err (!%p2313_p3)
}
 0x7ca   : > { %2146 = dma.vmem_to_hbm [thread:$0]  (%p2966_p7), %s1755_s28, 32, %s1752_s16, %s1741_s29  }
 0x7cb PF: > { %s2967_s25 = sld [smem:[#allocation11_spill]]  ;;  %p2970_p10 = scmp.ge.s32.totalorder %s2359_s21, 2 }
 0x7cc   : > { %s2968_s17 = sld [smem:[#allocation16_spill]] }
 0x7d1   : > { %s1766_s18 = sand.u32 1, %s2967_s25  }
 0x7d2   : > { %p2969_p8 = scmp.ne.s32.totalorder %s2968_s17, 0  ;;  %s1767_s1 = scalar_lea.sflag [#allocation4], %s1766_s18 }
 0x7d4   : > { %p2156_p2 = pnand %p2970_p10, %p2969_p8 }
 0x7d6   : > { %p2157_p4 = pneg %p2156_p2 }
 0x7d8   : > { %2342 = dma.done.wait (%p2157_p4), %s1767_s1, 32  }
 0x7d9   : > { %2344 = vsyncadd (%p2157_p4), %s1767_s1, 4294967264  ;;  %s2971_s21 = sld [smem:[#allocation13_spill]]  ;;  %s2974_s18 = smov %s2351_s19 }
 0x7da   : > { %s2972_s22 = sld [smem:[#allocation12_spill]] }
 0x7db   : > { %s2973_s20 = sld [smem:[#allocation14_spill]] }
 0x7df   : > { %p31_p5 = scmp.ge.s32.totalorder %s2971_s21, 4  }
 0x7e0   : > { %s2975_s19 = smov %s2972_s22 }
 0x7e1   :  { %33 = sbr.rel (!%p31_p5) target bundleno = 11 (0xb), region = 141 }
 0x7e6   :  { %1772 = vsyncpa [#allocation3], 1 }
 0x7e7   :  { %1774 = vsyncpa [#allocation3 + $0x1], 1 }
 0x7e8   :  { %1775 = vsyncpa [#allocation6], 1 }
 0x7e9   :  { %1777 = vsyncpa [#allocation6 + $0x1], 1 }
 0x7ea   :  { %1778 = vsyncpa [#allocation4], 1 }
 0x7eb   :  { %1780 = vsyncpa [#allocation4 + $0x1], 1 }

</bundles_post_ra>
